<compile_context>
chip_gen: v7x
topology: tpu7x:2x2x1
jax: 0.10.0
libtpu: 0.0.40
codegen_flags: <defaults>
</compile_context>

<pallas_src>
import functools

import jax
import jax.numpy as jnp
from jax import lax
from jax.experimental import pallas as pl
from jax.experimental.pallas import tpu as pltpu


# ----------------------------------------------------------------------------
# Fused gNet kernel (single invocation, in-kernel layer loop)
# ----------------------------------------------------------------------------
def _gnet_kernel(xn0_ref, xe0_ref,
                 k1no_ref, k2no_ref, k1eo_ref, k2eo_ref,
                 ke1_ref, ke2_ref, kn1_ref, kn2_ref, knout_ref,
                 grow_ref, gcol_ref, growt_ref, gcolt_ref,
                 xn_out_ref, xe_out_ref,
                 xn_s, xe_s, h1e_s, h1n_s,
                 *, hidden, hstep, nlayers, batch, n_nodes, n_edges):
    H = hidden
    f32 = jnp.float32
    bf16 = jnp.bfloat16

    def layer_norm_relu(x):
        # F.layer_norm(x, x.shape): stats over ALL elements, eps=1e-5, no affine.
        # One-pass moments: var = E[x^2] - mu^2.
        mu = jnp.mean(x)
        var = jnp.mean(x * x) - mu * mu
        return jnp.maximum((x - mu) * jax.lax.rsqrt(var + 1e-5), 0.0)

    def double_layer(x_bf, k1, k2):
        h1 = jnp.dot(x_bf, k1, preferred_element_type=f32)
        h1 = layer_norm_relu(h1)
        return jnp.dot(h1.astype(bf16), k2, preferred_element_type=f32)

    # --- opening doubleLayers -------------------------------------------------
    # TODO(synk): stochastic training-mode dropout (p=0.2) not reproduced.
    xn_s[...] = double_layer(xn0_ref[...], k1no_ref[...], k2no_ref[...])
    xe_s[...] = double_layer(xe0_ref[...], k1eo_ref[...], k2eo_ref[...])

    # Per-batch incidence matrices (graph shared across batch); {0,1} exact in bf16.
    g_row = grow_ref[...]        # (E, N)   gather operands
    g_col = gcol_ref[...]        # (E, N)
    g_row_t = growt_ref[...]     # (N, E)   scatter operands
    g_col_t = gcolt_ref[...]     # (N, E)

    # --- message-passing layers: in-kernel loop, carries live in VMEM scratch --
    def layer_body(layer, carry):
        ke1 = ke1_ref[layer]     # (3H, 2H)  this layer's weights (bf16, resident)
        ke2 = ke2_ref[layer]     # (2H, H)
        kn1 = kn1_ref[layer]     # (3H, 2H)
        kn2 = kn2_ref[layer]     # (2H, H)

        xn_old = xn_s[...]       # (B*N, H) f32
        xe_old = xe_s[...]       # (B*E, H) f32

        # -- edge update: doubleLayer(cat([xn[row], xn[col], xe]), KE1, KE2) ----
        # Concat folded into split-K partial matmuls; gathers are per-batch
        # (E,N)x(N,H) MXU matmuls.
        for b in range(batch):   # static, unrolled over the (small) batch
            nsl = slice(b * n_nodes, (b + 1) * n_nodes)
            esl = slice(b * n_edges, (b + 1) * n_edges)
            xn_b = xn_old[nsl, :].astype(bf16)                            # (N, H)
            xr_b = jnp.dot(g_row, xn_b, preferred_element_type=f32)       # (E, H)
            xc_b = jnp.dot(g_col, xn_b, preferred_element_type=f32)       # (E, H)
            xe_b = xe_old[esl, :].astype(bf16)                            # (E, H)
            h1e_s[esl, :] = (
                jnp.dot(xr_b.astype(bf16), ke1[0:H], preferred_element_type=f32)
                + jnp.dot(xc_b.astype(bf16), ke1[H:2 * H], preferred_element_type=f32)
                + jnp.dot(xe_b, ke1[2 * H:3 * H], preferred_element_type=f32))
        h1e = layer_norm_relu(h1e_s[...])                                 # global stats
        xec = jnp.dot(h1e.astype(bf16), ke2, preferred_element_type=f32)  # (B*E, H)

        # -- node update: doubleLayer(cat([edgeAve, edgeDiv, xn]), KN1, KN2) ----
        # ave/div from the two transposed-incidence products (2 scatters, not 4).
        for b in range(batch):
            nsl = slice(b * n_nodes, (b + 1) * n_nodes)
            esl = slice(b * n_edges, (b + 1) * n_edges)
            xec_b = xec[esl, :].astype(bf16)                              # (E, H)
            r_b = jnp.dot(g_row_t, xec_b, preferred_element_type=f32)     # (N, H)
            c_b = jnp.dot(g_col_t, xec_b, preferred_element_type=f32)     # (N, H)
            ave_b = 0.5 * (r_b + c_b)
            div_b = r_b - c_b
            xn_b = xn_old[nsl, :].astype(bf16)
            h1n_s[nsl, :] = (
                jnp.dot(ave_b.astype(bf16), kn1[0:H], preferred_element_type=f32)
                + jnp.dot(div_b.astype(bf16), kn1[H:2 * H], preferred_element_type=f32)
                + jnp.dot(xn_b, kn1[2 * H:3 * H], preferred_element_type=f32))
        h1n = layer_norm_relu(h1n_s[...])
        xnc = jnp.dot(h1n.astype(bf16), kn2, preferred_element_type=f32)  # (B*N, H)

        # -- residual carries (f32, VMEM-resident across the layer loop) --------
        xn_s[...] = xn_old + hstep * xnc
        xe_s[...] = xe_old + hstep * xec
        return carry

    lax.fori_loop(0, nlayers, layer_body, 0)

    # --- closing 1x1 conv: lane-dense (128-padded) output ----------------------
    xn_out_ref[...] = jnp.dot(xn_s[...].astype(bf16), knout_ref[...],
                              preferred_element_type=f32).astype(xn_out_ref.dtype)
    xe_out_ref[...] = xe_s[...].astype(xe_out_ref.dtype)


# ----------------------------------------------------------------------------
# Parameters (matches the PyTorch module's parameter shapes)
# ----------------------------------------------------------------------------
def gnet_init(key, x_input_size, edj_input_size, hidden_size, output_size, nlayers,
              stdv=0.001):
    ks = jax.random.split(key, 9)
    n = jax.random.normal
    return {
        'K1Nopen': n(ks[0], (hidden_size, x_input_size)) * stdv,
        'K2Nopen': n(ks[1], (hidden_size, hidden_size)) * stdv,
        'K1Eopen': n(ks[2], (hidden_size, edj_input_size)) * stdv,
        'K2Eopen': n(ks[3], (hidden_size, hidden_size)) * stdv,
        'KNout':   n(ks[4], (output_size, hidden_size)) * stdv,
        'KE1': n(ks[5], (nlayers, 2 * hidden_size, 3 * hidden_size)) * stdv,
        'KE2': n(ks[6], (nlayers, hidden_size, 2 * hidden_size)) * stdv,
        'KN1': n(ks[7], (nlayers, 2 * hidden_size, 3 * hidden_size)) * stdv,
        'KN2': n(ks[8], (nlayers, hidden_size, 2 * hidden_size)) * stdv,
    }


# ----------------------------------------------------------------------------
# gNet forward (public layout is the original PyTorch (B, C, L))
# ----------------------------------------------------------------------------
def gnet_forward(params, xn, xe, row, col, nnodes, h=0.1):
    """xn: (B, x_in, N) node feats; xe: (B, e_in, E) edge feats (NCL layout)."""
    B, x_in, N = xn.shape
    _, e_in, E = xe.shape
    H = params['K2Nopen'].shape[0]
    out_size = params['KNout'].shape[0]
    nlayers = params['KE1'].shape[0]
    BN, BE = B * N, B * E
    f32, bf16 = jnp.float32, jnp.bfloat16
    out_pad = ((out_size + 127) // 128) * 128        # lane-dense closing projection

    # One boundary transpose: channels-last, batch flattened into rows.
    xn2 = jnp.transpose(xn, (0, 2, 1)).reshape(BN, x_in).astype(bf16)    # (B*N, x_in)
    xe2 = jnp.transpose(xe, (0, 2, 1)).reshape(BE, e_in).astype(bf16)    # (B*E, e_in)

    # Per-batch incidence matrices (shared across batch); values {0,1} -> exact bf16.
    g_row = jax.nn.one_hot(row, nnodes, dtype=f32).astype(bf16)          # (E, N)
    g_col = jax.nn.one_hot(col, nnodes, dtype=f32).astype(bf16)          # (E, N)
    g_row_t = g_row.T                                                    # (N, E)
    g_col_t = g_col.T                                                    # (N, E)

    # Pre-transpose weights once to channels-last (Cin, Cout); bf16 operands.
    k1no = params['K1Nopen'].T.astype(bf16)                              # (x_in, H)
    k2no = params['K2Nopen'].T.astype(bf16)                              # (H, H)
    k1eo = params['K1Eopen'].T.astype(bf16)                              # (e_in, H)
    k2eo = params['K2Eopen'].T.astype(bf16)                              # (H, H)
    knout = jnp.pad(params['KNout'].T,
                    ((0, 0), (0, out_pad - out_size))).astype(bf16)      # (H, out_pad)
    ke1 = jnp.transpose(params['KE1'], (0, 2, 1)).astype(bf16)           # (L, 3H, 2H)
    ke2 = jnp.transpose(params['KE2'], (0, 2, 1)).astype(bf16)           # (L, 2H, H)
    kn1 = jnp.transpose(params['KN1'], (0, 2, 1)).astype(bf16)
    kn2 = jnp.transpose(params['KN2'], (0, 2, 1)).astype(bf16)

    kernel = functools.partial(_gnet_kernel, hidden=H, hstep=float(h),
                               nlayers=int(nlayers), batch=int(B),
                               n_nodes=int(N), n_edges=int(E))

    # Grid-less pallas_call: every input is DMA'd to VMEM once (single buffer),
    # the layer loop runs inside the kernel with f32 carries in VMEM scratch.
    xn_out2, xe_out2 = pl.pallas_call(
        kernel,
        out_shape=(jax.ShapeDtypeStruct((BN, out_pad), f32),
                   jax.ShapeDtypeStruct((BE, H), f32)),
        scratch_shapes=[pltpu.VMEM((BN, H), f32),        # xn carry
                        pltpu.VMEM((BE, H), f32),        # xe carry
                        pltpu.VMEM((BE, 2 * H), f32),    # edge hidden (pre-LN)
                        pltpu.VMEM((BN, 2 * H), f32)],   # node hidden (pre-LN)
        compiler_params=pltpu.CompilerParams(
            vmem_limit_bytes=48 * 1024 * 1024),          # within v7x 64 MiB physical
    )(xn2, xe2, k1no, k2no, k1eo, k2eo, ke1, ke2, kn1, kn2, knout,
      g_row, g_col, g_row_t, g_col_t)

    # Back to the public (B, C, L) layout; drop the lane padding of the output.
    xn_out = jnp.transpose(xn_out2[:, :out_size].reshape(B, N, out_size),
                           (0, 2, 1)).astype(xn.dtype)
    xe_out = jnp.transpose(xe_out2.reshape(B, E, H), (0, 2, 1)).astype(xe.dtype)
    return xn_out, xe_out


# ----------------------------------------------------------------------------
if __name__ == "__main__":
    key = jax.random.PRNGKey(0)
    k_par, k_xn, k_xe, k_row, k_col = jax.random.split(key, 5)

    # small problem sizes (N, E kept multiples of 8 for aligned per-batch slabs)
    B = 2
    x_input_size = 4
    edj_input_size = 5
    hidden_size = 32
    output_size = 8
    nlayers = 2
    N = 16   # nodes
    E = 24   # edges
    h = 0.1

    params = gnet_init(k_par, x_input_size, edj_input_size, hidden_size,
                       output_size, nlayers)

    xn = jax.random.normal(k_xn, (B, x_input_size, N), dtype=jnp.float32)
    xe = jax.random.normal(k_xe, (B, edj_input_size, E), dtype=jnp.float32)
    row = jax.random.randint(k_row, (E,), 0, N)
    col = jax.random.randint(k_col, (E,), 0, N)

    fwd = functools.partial(gnet_forward, nnodes=N, h=h)
    out_xn, out_xe = fwd(params, xn, xe, row, col)
    jax.block_until_ready((out_xn, out_xe))

    assert out_xn.shape == (B, output_size, N)
    assert out_xe.shape == (B, hidden_size, E)
    print("KERNEL_OK")
</pallas_src>

<mosaic_0001>
module attributes {stable_mosaic.version = 11 : i64} {
  func.func @_gnet_kernel(%arg0: memref<32x4xbf16, #tpu.memory_space<vmem>>, %arg1: memref<48x5xbf16, #tpu.memory_space<vmem>>, %arg2: memref<4x32xbf16, #tpu.memory_space<vmem>>, %arg3: memref<32x32xbf16, #tpu.memory_space<vmem>>, %arg4: memref<5x32xbf16, #tpu.memory_space<vmem>>, %arg5: memref<32x32xbf16, #tpu.memory_space<vmem>>, %arg6: memref<2x96x64xbf16, #tpu.memory_space<vmem>>, %arg7: memref<2x64x32xbf16, #tpu.memory_space<vmem>>, %arg8: memref<2x96x64xbf16, #tpu.memory_space<vmem>>, %arg9: memref<2x64x32xbf16, #tpu.memory_space<vmem>>, %arg10: memref<32x128xbf16, #tpu.memory_space<vmem>>, %arg11: memref<24x16xbf16, #tpu.memory_space<vmem>>, %arg12: memref<24x16xbf16, #tpu.memory_space<vmem>>, %arg13: memref<16x24xbf16, #tpu.memory_space<vmem>>, %arg14: memref<16x24xbf16, #tpu.memory_space<vmem>>, %arg15: memref<32x128xf32, #tpu.memory_space<vmem>>, %arg16: memref<48x32xf32, #tpu.memory_space<vmem>>, %arg17: memref<32x32xf32, #tpu.memory_space<vmem>>, %arg18: memref<48x32xf32, #tpu.memory_space<vmem>>, %arg19: memref<48x64xf32, #tpu.memory_space<vmem>>, %arg20: memref<32x64xf32, #tpu.memory_space<vmem>>) attributes {dimension_semantics = [], scalar_prefetch = 0 : i64, scratch_operands = 4 : i64, tpu.core_type = #tpu.core_type<tc>} {
    %c0 = arith.constant 0 : index
    %c0_0 = arith.constant 0 : index
    %0 = vector.load %arg0[%c0, %c0_0] : memref<32x4xbf16, #tpu.memory_space<vmem>>, vector<32x4xbf16>
    %c0_1 = arith.constant 0 : index
    %c0_2 = arith.constant 0 : index
    %1 = vector.load %arg2[%c0_1, %c0_2] : memref<4x32xbf16, #tpu.memory_space<vmem>>, vector<4x32xbf16>
    %c0_3 = arith.constant 0 : index
    %c0_4 = arith.constant 0 : index
    %2 = vector.load %arg3[%c0_3, %c0_4] : memref<32x32xbf16, #tpu.memory_space<vmem>>, vector<32x32xbf16>
    %cst = arith.constant dense<0.000000e+00> : vector<32x32xf32>
    %3 = tpu.matmul %0, %1, %cst {dimension_numbers = #tpu.dot_dimension_numbers<[1], [0], [0], [1], [0, 0, 1, 1], [], []>} : vector<32x4xbf16>, vector<4x32xbf16>, vector<32x32xf32> -> vector<32x32xf32>
    %4 = vector.shape_cast %3 : vector<32x32xf32> to vector<1x32x32xf32>
    %cst_5 = arith.constant dense<0.000000e+00> : vector<1xf32>
    %5 = vector.multi_reduction <add>, %4, %cst_5 [1, 2] : vector<1x32x32xf32> to vector<1xf32>
    %6 = vector.shape_cast %5 : vector<1xf32> to vector<1x1x1xf32>
    %7 = vector.extract %6[0, 0, 0] : f32 from vector<1x1x1xf32>
    %cst_6 = arith.constant 1.024000e+03 : f32
    %8 = arith.divf %7, %cst_6 : f32
    %9 = arith.mulf %3, %3 : vector<32x32xf32>
    %10 = vector.shape_cast %9 : vector<32x32xf32> to vector<1x32x32xf32>
    %cst_7 = arith.constant dense<0.000000e+00> : vector<1xf32>
    %11 = vector.multi_reduction <add>, %10, %cst_7 [1, 2] : vector<1x32x32xf32> to vector<1xf32>
    %12 = vector.shape_cast %11 : vector<1xf32> to vector<1x1x1xf32>
    %13 = vector.extract %12[0, 0, 0] : f32 from vector<1x1x1xf32>
    %cst_8 = arith.constant 1.024000e+03 : f32
    %14 = arith.divf %13, %cst_8 : f32
    %15 = arith.mulf %8, %8 : f32
    %16 = arith.subf %14, %15 : f32
    %17 = vector.broadcast %8 : f32 to vector<32x32xf32>
    %18 = arith.subf %3, %17 : vector<32x32xf32>
    %cst_9 = arith.constant 9.99999974E-6 : f32
    %19 = arith.addf %16, %cst_9 : f32
    %20 = math.rsqrt %19 : f32
    %21 = vector.broadcast %20 : f32 to vector<32x32xf32>
    %22 = arith.mulf %18, %21 : vector<32x32xf32>
    %cst_10 = arith.constant 0.000000e+00 : f32
    %23 = vector.broadcast %cst_10 : f32 to vector<32x32xf32>
    %24 = arith.maximumf %22, %23 : vector<32x32xf32>
    %25 = arith.truncf %24 : vector<32x32xf32> to vector<32x32xbf16>
    %cst_11 = arith.constant dense<0.000000e+00> : vector<32x32xf32>
    %26 = tpu.matmul %25, %2, %cst_11 {dimension_numbers = #tpu.dot_dimension_numbers<[1], [0], [0], [1], [0, 0, 1, 1], [], []>} : vector<32x32xbf16>, vector<32x32xbf16>, vector<32x32xf32> -> vector<32x32xf32>
    %c0_12 = arith.constant 0 : index
    %c0_13 = arith.constant 0 : index
    %27 = vector.load %arg17[%c0_12, %c0_13] : memref<32x32xf32, #tpu.memory_space<vmem>>, vector<32x32xf32>
    tpu.vector_store %arg17[%c0_12, %c0_13], %26 {strides = array<i32>} : memref<32x32xf32, #tpu.memory_space<vmem>>, vector<32x32xf32>,
    %c0_14 = arith.constant 0 : index
    %c0_15 = arith.constant 0 : index
    %28 = vector.load %arg1[%c0_14, %c0_15] : memref<48x5xbf16, #tpu.memory_space<vmem>>, vector<48x5xbf16>
    %c0_16 = arith.constant 0 : index
    %c0_17 = arith.constant 0 : index
    %29 = vector.load %arg4[%c0_16, %c0_17] : memref<5x32xbf16, #tpu.memory_space<vmem>>, vector<5x32xbf16>
    %c0_18 = arith.constant 0 : index
    %c0_19 = arith.constant 0 : index
    %30 = vector.load %arg5[%c0_18, %c0_19] : memref<32x32xbf16, #tpu.memory_space<vmem>>, vector<32x32xbf16>
    %cst_20 = arith.constant dense<0.000000e+00> : vector<48x32xf32>
    %31 = tpu.matmul %28, %29, %cst_20 {dimension_numbers = #tpu.dot_dimension_numbers<[1], [0], [0], [1], [0, 0, 1, 1], [], []>} : vector<48x5xbf16>, vector<5x32xbf16>, vector<48x32xf32> -> vector<48x32xf32>
    %32 = vector.shape_cast %31 : vector<48x32xf32> to vector<1x48x32xf32>
    %cst_21 = arith.constant dense<0.000000e+00> : vector<1xf32>
    %33 = vector.multi_reduction <add>, %32, %cst_21 [1, 2] : vector<1x48x32xf32> to vector<1xf32>
    %34 = vector.shape_cast %33 : vector<1xf32> to vector<1x1x1xf32>
    %35 = vector.extract %34[0, 0, 0] : f32 from vector<1x1x1xf32>
    %cst_22 = arith.constant 1.536000e+03 : f32
    %36 = arith.divf %35, %cst_22 : f32
    %37 = arith.mulf %31, %31 : vector<48x32xf32>
    %38 = vector.shape_cast %37 : vector<48x32xf32> to vector<1x48x32xf32>
    %cst_23 = arith.constant dense<0.000000e+00> : vector<1xf32>
    %39 = vector.multi_reduction <add>, %38, %cst_23 [1, 2] : vector<1x48x32xf32> to vector<1xf32>
    %40 = vector.shape_cast %39 : vector<1xf32> to vector<1x1x1xf32>
    %41 = vector.extract %40[0, 0, 0] : f32 from vector<1x1x1xf32>
    %cst_24 = arith.constant 1.536000e+03 : f32
    %42 = arith.divf %41, %cst_24 : f32
    %43 = arith.mulf %36, %36 : f32
    %44 = arith.subf %42, %43 : f32
    %45 = vector.broadcast %36 : f32 to vector<48x32xf32>
    %46 = arith.subf %31, %45 : vector<48x32xf32>
    %cst_25 = arith.constant 9.99999974E-6 : f32
    %47 = arith.addf %44, %cst_25 : f32
    %48 = math.rsqrt %47 : f32
    %49 = vector.broadcast %48 : f32 to vector<48x32xf32>
    %50 = arith.mulf %46, %49 : vector<48x32xf32>
    %cst_26 = arith.constant 0.000000e+00 : f32
    %51 = vector.broadcast %cst_26 : f32 to vector<48x32xf32>
    %52 = arith.maximumf %50, %51 : vector<48x32xf32>
    %53 = arith.truncf %52 : vector<48x32xf32> to vector<48x32xbf16>
    %cst_27 = arith.constant dense<0.000000e+00> : vector<48x32xf32>
    %54 = tpu.matmul %53, %30, %cst_27 {dimension_numbers = #tpu.dot_dimension_numbers<[1], [0], [0], [1], [0, 0, 1, 1], [], []>} : vector<48x32xbf16>, vector<32x32xbf16>, vector<48x32xf32> -> vector<48x32xf32>
    %c0_28 = arith.constant 0 : index
    %c0_29 = arith.constant 0 : index
    %55 = vector.load %arg18[%c0_28, %c0_29] : memref<48x32xf32, #tpu.memory_space<vmem>>, vector<48x32xf32>
    tpu.vector_store %arg18[%c0_28, %c0_29], %54 {strides = array<i32>} : memref<48x32xf32, #tpu.memory_space<vmem>>, vector<48x32xf32>,
    %c0_30 = arith.constant 0 : index
    %c0_31 = arith.constant 0 : index
    %56 = vector.load %arg11[%c0_30, %c0_31] : memref<24x16xbf16, #tpu.memory_space<vmem>>, vector<24x16xbf16>
    %c0_32 = arith.constant 0 : index
    %c0_33 = arith.constant 0 : index
    %57 = vector.load %arg12[%c0_32, %c0_33] : memref<24x16xbf16, #tpu.memory_space<vmem>>, vector<24x16xbf16>
    %c0_34 = arith.constant 0 : index
    %c0_35 = arith.constant 0 : index
    %58 = vector.load %arg13[%c0_34, %c0_35] : memref<16x24xbf16, #tpu.memory_space<vmem>>, vector<16x24xbf16>
    %c0_36 = arith.constant 0 : index
    %c0_37 = arith.constant 0 : index
    %59 = vector.load %arg14[%c0_36, %c0_37] : memref<16x24xbf16, #tpu.memory_space<vmem>>, vector<16x24xbf16>
    %c0_i32 = arith.constant 0 : i32
    %c2_i32 = arith.constant 2 : i32
    %60 = arith.addi %c0_i32, %c2_i32 : i32
    %c1_i32 = arith.constant 1 : i32
    scf.for %arg21 = %c0_i32 to %60 step %c1_i32  : i32 {
      %68 = arith.index_cast %arg21 : i32 to index
      %c0_50 = arith.constant 0 : index
      %c0_51 = arith.constant 0 : index
      %69 = vector.load %arg6[%68, %c0_50, %c0_51] : memref<2x96x64xbf16, #tpu.memory_space<vmem>>, vector<1x96x64xbf16>
      %70 = vector.shape_cast %69 : vector<1x96x64xbf16> to vector<96x64xbf16>
      %71 = arith.index_cast %arg21 : i32 to index
      %c0_52 = arith.constant 0 : index
      %c0_53 = arith.constant 0 : index
      %72 = vector.load %arg7[%71, %c0_52, %c0_53] : memref<2x64x32xbf16, #tpu.memory_space<vmem>>, vector<1x64x32xbf16>
      %73 = vector.shape_cast %72 : vector<1x64x32xbf16> to vector<64x32xbf16>
      %74 = arith.index_cast %arg21 : i32 to index
      %c0_54 = arith.constant 0 : index
      %c0_55 = arith.constant 0 : index
      %75 = vector.load %arg8[%74, %c0_54, %c0_55] : memref<2x96x64xbf16, #tpu.memory_space<vmem>>, vector<1x96x64xbf16>
      %76 = vector.shape_cast %75 : vector<1x96x64xbf16> to vector<96x64xbf16>
      %77 = arith.index_cast %arg21 : i32 to index
      %c0_56 = arith.constant 0 : index
      %c0_57 = arith.constant 0 : index
      %78 = vector.load %arg9[%77, %c0_56, %c0_57] : memref<2x64x32xbf16, #tpu.memory_space<vmem>>, vector<1x64x32xbf16>
      %79 = vector.shape_cast %78 : vector<1x64x32xbf16> to vector<64x32xbf16>
      %c0_58 = arith.constant 0 : index
      %c0_59 = arith.constant 0 : index
      %80 = vector.load %arg17[%c0_58, %c0_59] : memref<32x32xf32, #tpu.memory_space<vmem>>, vector<32x32xf32>
      %c0_60 = arith.constant 0 : index
      %c0_61 = arith.constant 0 : index
      %81 = vector.load %arg18[%c0_60, %c0_61] : memref<48x32xf32, #tpu.memory_space<vmem>>, vector<48x32xf32>
      %82 = vector.extract_strided_slice %80 {offsets = [0, 0], sizes = [16, 32], strides = [1, 1]} : vector<32x32xf32> to vector<16x32xf32>
      %83 = arith.truncf %82 : vector<16x32xf32> to vector<16x32xbf16>
      %cst_62 = arith.constant dense<0.000000e+00> : vector<24x32xf32>
      %84 = tpu.matmul %56, %83, %cst_62 {dimension_numbers = #tpu.dot_dimension_numbers<[1], [0], [0], [1], [0, 0, 1, 1], [], []>} : vector<24x16xbf16>, vector<16x32xbf16>, vector<24x32xf32> -> vector<24x32xf32>
      %cst_63 = arith.constant dense<0.000000e+00> : vector<24x32xf32>
      %85 = tpu.matmul %57, %83, %cst_63 {dimension_numbers = #tpu.dot_dimension_numbers<[1], [0], [0], [1], [0, 0, 1, 1], [], []>} : vector<24x16xbf16>, vector<16x32xbf16>, vector<24x32xf32> -> vector<24x32xf32>
      %86 = vector.extract_strided_slice %81 {offsets = [0, 0], sizes = [24, 32], strides = [1, 1]} : vector<48x32xf32> to vector<24x32xf32>
      %87 = arith.truncf %86 : vector<24x32xf32> to vector<24x32xbf16>
      %88 = arith.truncf %84 : vector<24x32xf32> to vector<24x32xbf16>
      %89 = vector.extract_strided_slice %70 {offsets = [0, 0], sizes = [32, 64], strides = [1, 1]} : vector<96x64xbf16> to vector<32x64xbf16>
      %cst_64 = arith.constant dense<0.000000e+00> : vector<24x64xf32>
      %90 = tpu.matmul %88, %89, %cst_64 {dimension_numbers = #tpu.dot_dimension_numbers<[1], [0], [0], [1], [0, 0, 1, 1], [], []>} : vector<24x32xbf16>, vector<32x64xbf16>, vector<24x64xf32> -> vector<24x64xf32>
      %91 = arith.truncf %85 : vector<24x32xf32> to vector<24x32xbf16>
      %92 = vector.extract_strided_slice %70 {offsets = [32, 0], sizes = [32, 64], strides = [1, 1]} : vector<96x64xbf16> to vector<32x64xbf16>
      %cst_65 = arith.constant dense<0.000000e+00> : vector<24x64xf32>
      %93 = tpu.matmul %91, %92, %cst_65 {dimension_numbers = #tpu.dot_dimension_numbers<[1], [0], [0], [1], [0, 0, 1, 1], [], []>} : vector<24x32xbf16>, vector<32x64xbf16>, vector<24x64xf32> -> vector<24x64xf32>
      %94 = arith.addf %90, %93 : vector<24x64xf32>
      %95 = vector.extract_strided_slice %70 {offsets = [64, 0], sizes = [32, 64], strides = [1, 1]} : vector<96x64xbf16> to vector<32x64xbf16>
      %cst_66 = arith.constant dense<0.000000e+00> : vector<24x64xf32>
      %96 = tpu.matmul %87, %95, %cst_66 {dimension_numbers = #tpu.dot_dimension_numbers<[1], [0], [0], [1], [0, 0, 1, 1], [], []>} : vector<24x32xbf16>, vector<32x64xbf16>, vector<24x64xf32> -> vector<24x64xf32>
      %97 = arith.addf %94, %96 : vector<24x64xf32>
      %c0_67 = arith.constant 0 : index
      %c0_68 = arith.constant 0 : index
      %98 = vector.load %arg19[%c0_67, %c0_68] : memref<48x64xf32, #tpu.memory_space<vmem>>, vector<24x64xf32>
      tpu.vector_store %arg19[%c0_67, %c0_68], %97 {strides = array<i32>} : memref<48x64xf32, #tpu.memory_space<vmem>>, vector<24x64xf32>,
      %99 = vector.extract_strided_slice %80 {offsets = [16, 0], sizes = [16, 32], strides = [1, 1]} : vector<32x32xf32> to vector<16x32xf32>
      %100 = arith.truncf %99 : vector<16x32xf32> to vector<16x32xbf16>
      %cst_69 = arith.constant dense<0.000000e+00> : vector<24x32xf32>
      %101 = tpu.matmul %56, %100, %cst_69 {dimension_numbers = #tpu.dot_dimension_numbers<[1], [0], [0], [1], [0, 0, 1, 1], [], []>} : vector<24x16xbf16>, vector<16x32xbf16>, vector<24x32xf32> -> vector<24x32xf32>
      %cst_70 = arith.constant dense<0.000000e+00> : vector<24x32xf32>
      %102 = tpu.matmul %57, %100, %cst_70 {dimension_numbers = #tpu.dot_dimension_numbers<[1], [0], [0], [1], [0, 0, 1, 1], [], []>} : vector<24x16xbf16>, vector<16x32xbf16>, vector<24x32xf32> -> vector<24x32xf32>
      %103 = vector.extract_strided_slice %81 {offsets = [24, 0], sizes = [24, 32], strides = [1, 1]} : vector<48x32xf32> to vector<24x32xf32>
      %104 = arith.truncf %103 : vector<24x32xf32> to vector<24x32xbf16>
      %105 = arith.truncf %101 : vector<24x32xf32> to vector<24x32xbf16>
      %106 = vector.extract_strided_slice %70 {offsets = [0, 0], sizes = [32, 64], strides = [1, 1]} : vector<96x64xbf16> to vector<32x64xbf16>
      %cst_71 = arith.constant dense<0.000000e+00> : vector<24x64xf32>
      %107 = tpu.matmul %105, %106, %cst_71 {dimension_numbers = #tpu.dot_dimension_numbers<[1], [0], [0], [1], [0, 0, 1, 1], [], []>} : vector<24x32xbf16>, vector<32x64xbf16>, vector<24x64xf32> -> vector<24x64xf32>
      %108 = arith.truncf %102 : vector<24x32xf32> to vector<24x32xbf16>
      %109 = vector.extract_strided_slice %70 {offsets = [32, 0], sizes = [32, 64], strides = [1, 1]} : vector<96x64xbf16> to vector<32x64xbf16>
      %cst_72 = arith.constant dense<0.000000e+00> : vector<24x64xf32>
      %110 = tpu.matmul %108, %109, %cst_72 {dimension_numbers = #tpu.dot_dimension_numbers<[1], [0], [0], [1], [0, 0, 1, 1], [], []>} : vector<24x32xbf16>, vector<32x64xbf16>, vector<24x64xf32> -> vector<24x64xf32>
      %111 = arith.addf %107, %110 : vector<24x64xf32>
      %112 = vector.extract_strided_slice %70 {offsets = [64, 0], sizes = [32, 64], strides = [1, 1]} : vector<96x64xbf16> to vector<32x64xbf16>
      %cst_73 = arith.constant dense<0.000000e+00> : vector<24x64xf32>
      %113 = tpu.matmul %104, %112, %cst_73 {dimension_numbers = #tpu.dot_dimension_numbers<[1], [0], [0], [1], [0, 0, 1, 1], [], []>} : vector<24x32xbf16>, vector<32x64xbf16>, vector<24x64xf32> -> vector<24x64xf32>
      %114 = arith.addf %111, %113 : vector<24x64xf32>
      %c24 = arith.constant 24 : index
      %c0_74 = arith.constant 0 : index
      %115 = vector.load %arg19[%c24, %c0_74] : memref<48x64xf32, #tpu.memory_space<vmem>>, vector<24x64xf32>
      tpu.vector_store %arg19[%c24, %c0_74], %114 {strides = array<i32>} : memref<48x64xf32, #tpu.memory_space<vmem>>, vector<24x64xf32>,
      %c0_75 = arith.constant 0 : index
      %c0_76 = arith.constant 0 : index
      %116 = vector.load %arg19[%c0_75, %c0_76] : memref<48x64xf32, #tpu.memory_space<vmem>>, vector<48x64xf32>
      %117 = vector.shape_cast %116 : vector<48x64xf32> to vector<1x48x64xf32>
      %cst_77 = arith.constant dense<0.000000e+00> : vector<1xf32>
      %118 = vector.multi_reduction <add>, %117, %cst_77 [1, 2] : vector<1x48x64xf32> to vector<1xf32>
      %119 = vector.shape_cast %118 : vector<1xf32> to vector<1x1x1xf32>
      %120 = vector.extract %119[0, 0, 0] : f32 from vector<1x1x1xf32>
      %cst_78 = arith.constant 3.072000e+03 : f32
      %121 = arith.divf %120, %cst_78 : f32
      %122 = arith.mulf %116, %116 : vector<48x64xf32>
      %123 = vector.shape_cast %122 : vector<48x64xf32> to vector<1x48x64xf32>
      %cst_79 = arith.constant dense<0.000000e+00> : vector<1xf32>
      %124 = vector.multi_reduction <add>, %123, %cst_79 [1, 2] : vector<1x48x64xf32> to vector<1xf32>
      %125 = vector.shape_cast %124 : vector<1xf32> to vector<1x1x1xf32>
      %126 = vector.extract %125[0, 0, 0] : f32 from vector<1x1x1xf32>
      %cst_80 = arith.constant 3.072000e+03 : f32
      %127 = arith.divf %126, %cst_80 : f32
      %128 = arith.mulf %121, %121 : f32
      %129 = arith.subf %127, %128 : f32
      %130 = vector.broadcast %121 : f32 to vector<48x64xf32>
      %131 = arith.subf %116, %130 : vector<48x64xf32>
      %cst_81 = arith.constant 9.99999974E-6 : f32
      %132 = arith.addf %129, %cst_81 : f32
      %133 = math.rsqrt %132 : f32
      %134 = vector.broadcast %133 : f32 to vector<48x64xf32>
      %135 = arith.mulf %131, %134 : vector<48x64xf32>
      %cst_82 = arith.constant 0.000000e+00 : f32
      %136 = vector.broadcast %cst_82 : f32 to vector<48x64xf32>
      %137 = arith.maximumf %135, %136 : vector<48x64xf32>
      %138 = arith.truncf %137 : vector<48x64xf32> to vector<48x64xbf16>
      %cst_83 = arith.constant dense<0.000000e+00> : vector<48x32xf32>
      %139 = tpu.matmul %138, %73, %cst_83 {dimension_numbers = #tpu.dot_dimension_numbers<[1], [0], [0], [1], [0, 0, 1, 1], [], []>} : vector<48x64xbf16>, vector<64x32xbf16>, vector<48x32xf32> -> vector<48x32xf32>
      %140 = vector.extract_strided_slice %139 {offsets = [0, 0], sizes = [24, 32], strides = [1, 1]} : vector<48x32xf32> to vector<24x32xf32>
      %141 = arith.truncf %140 : vector<24x32xf32> to vector<24x32xbf16>
      %cst_84 = arith.constant dense<0.000000e+00> : vector<16x32xf32>
      %142 = tpu.matmul %58, %141, %cst_84 {dimension_numbers = #tpu.dot_dimension_numbers<[1], [0], [0], [1], [0, 0, 1, 1], [], []>} : vector<16x24xbf16>, vector<24x32xbf16>, vector<16x32xf32> -> vector<16x32xf32>
      %cst_85 = arith.constant dense<0.000000e+00> : vector<16x32xf32>
      %143 = tpu.matmul %59, %141, %cst_85 {dimension_numbers = #tpu.dot_dimension_numbers<[1], [0], [0], [1], [0, 0, 1, 1], [], []>} : vector<16x24xbf16>, vector<24x32xbf16>, vector<16x32xf32> -> vector<16x32xf32>
      %144 = arith.addf %142, %143 : vector<16x32xf32>
      %cst_86 = arith.constant 5.000000e-01 : f32
      %145 = vector.broadcast %cst_86 : f32 to vector<16x32xf32>
      %146 = arith.mulf %145, %144 : vector<16x32xf32>
      %147 = arith.subf %142, %143 : vector<16x32xf32>
      %148 = vector.extract_strided_slice %80 {offsets = [0, 0], sizes = [16, 32], strides = [1, 1]} : vector<32x32xf32> to vector<16x32xf32>
      %149 = arith.truncf %148 : vector<16x32xf32> to vector<16x32xbf16>
      %150 = arith.truncf %146 : vector<16x32xf32> to vector<16x32xbf16>
      %151 = vector.extract_strided_slice %76 {offsets = [0, 0], sizes = [32, 64], strides = [1, 1]} : vector<96x64xbf16> to vector<32x64xbf16>
      %cst_87 = arith.constant dense<0.000000e+00> : vector<16x64xf32>
      %152 = tpu.matmul %150, %151, %cst_87 {dimension_numbers = #tpu.dot_dimension_numbers<[1], [0], [0], [1], [0, 0, 1, 1], [], []>} : vector<16x32xbf16>, vector<32x64xbf16>, vector<16x64xf32> -> vector<16x64xf32>
      %153 = arith.truncf %147 : vector<16x32xf32> to vector<16x32xbf16>
      %154 = vector.extract_strided_slice %76 {offsets = [32, 0], sizes = [32, 64], strides = [1, 1]} : vector<96x64xbf16> to vector<32x64xbf16>
      %cst_88 = arith.constant dense<0.000000e+00> : vector<16x64xf32>
      %155 = tpu.matmul %153, %154, %cst_88 {dimension_numbers = #tpu.dot_dimension_numbers<[1], [0], [0], [1], [0, 0, 1, 1], [], []>} : vector<16x32xbf16>, vector<32x64xbf16>, vector<16x64xf32> -> vector<16x64xf32>
      %156 = arith.addf %152, %155 : vector<16x64xf32>
      %157 = vector.extract_strided_slice %76 {offsets = [64, 0], sizes = [32, 64], strides = [1, 1]} : vector<96x64xbf16> to vector<32x64xbf16>
      %cst_89 = arith.constant dense<0.000000e+00> : vector<16x64xf32>
      %158 = tpu.matmul %149, %157, %cst_89 {dimension_numbers = #tpu.dot_dimension_numbers<[1], [0], [0], [1], [0, 0, 1, 1], [], []>} : vector<16x32xbf16>, vector<32x64xbf16>, vector<16x64xf32> -> vector<16x64xf32>
      %159 = arith.addf %156, %158 : vector<16x64xf32>
      %c0_90 = arith.constant 0 : index
      %c0_91 = arith.constant 0 : index
      %160 = vector.load %arg20[%c0_90, %c0_91] : memref<32x64xf32, #tpu.memory_space<vmem>>, vector<16x64xf32>
      tpu.vector_store %arg20[%c0_90, %c0_91], %159 {strides = array<i32>} : memref<32x64xf32, #tpu.memory_space<vmem>>, vector<16x64xf32>,
      %161 = vector.extract_strided_slice %139 {offsets = [24, 0], sizes = [24, 32], strides = [1, 1]} : vector<48x32xf32> to vector<24x32xf32>
      %162 = arith.truncf %161 : vector<24x32xf32> to vector<24x32xbf16>
      %cst_92 = arith.constant dense<0.000000e+00> : vector<16x32xf32>
      %163 = tpu.matmul %58, %162, %cst_92 {dimension_numbers = #tpu.dot_dimension_numbers<[1], [0], [0], [1], [0, 0, 1, 1], [], []>} : vector<16x24xbf16>, vector<24x32xbf16>, vector<16x32xf32> -> vector<16x32xf32>
      %cst_93 = arith.constant dense<0.000000e+00> : vector<16x32xf32>
      %164 = tpu.matmul %59, %162, %cst_93 {dimension_numbers = #tpu.dot_dimension_numbers<[1], [0], [0], [1], [0, 0, 1, 1], [], []>} : vector<16x24xbf16>, vector<24x32xbf16>, vector<16x32xf32> -> vector<16x32xf32>
      %165 = arith.addf %163, %164 : vector<16x32xf32>
      %cst_94 = arith.constant 5.000000e-01 : f32
      %166 = vector.broadcast %cst_94 : f32 to vector<16x32xf32>
      %167 = arith.mulf %166, %165 : vector<16x32xf32>
      %168 = arith.subf %163, %164 : vector<16x32xf32>
      %169 = vector.extract_strided_slice %80 {offsets = [16, 0], sizes = [16, 32], strides = [1, 1]} : vector<32x32xf32> to vector<16x32xf32>
      %170 = arith.truncf %169 : vector<16x32xf32> to vector<16x32xbf16>
      %171 = arith.truncf %167 : vector<16x32xf32> to vector<16x32xbf16>
      %172 = vector.extract_strided_slice %76 {offsets = [0, 0], sizes = [32, 64], strides = [1, 1]} : vector<96x64xbf16> to vector<32x64xbf16>
      %cst_95 = arith.constant dense<0.000000e+00> : vector<16x64xf32>
      %173 = tpu.matmul %171, %172, %cst_95 {dimension_numbers = #tpu.dot_dimension_numbers<[1], [0], [0], [1], [0, 0, 1, 1], [], []>} : vector<16x32xbf16>, vector<32x64xbf16>, vector<16x64xf32> -> vector<16x64xf32>
      %174 = arith.truncf %168 : vector<16x32xf32> to vector<16x32xbf16>
      %175 = vector.extract_strided_slice %76 {offsets = [32, 0], sizes = [32, 64], strides = [1, 1]} : vector<96x64xbf16> to vector<32x64xbf16>
      %cst_96 = arith.constant dense<0.000000e+00> : vector<16x64xf32>
      %176 = tpu.matmul %174, %175, %cst_96 {dimension_numbers = #tpu.dot_dimension_numbers<[1], [0], [0], [1], [0, 0, 1, 1], [], []>} : vector<16x32xbf16>, vector<32x64xbf16>, vector<16x64xf32> -> vector<16x64xf32>
      %177 = arith.addf %173, %176 : vector<16x64xf32>
      %178 = vector.extract_strided_slice %76 {offsets = [64, 0], sizes = [32, 64], strides = [1, 1]} : vector<96x64xbf16> to vector<32x64xbf16>
      %cst_97 = arith.constant dense<0.000000e+00> : vector<16x64xf32>
      %179 = tpu.matmul %170, %178, %cst_97 {dimension_numbers = #tpu.dot_dimension_numbers<[1], [0], [0], [1], [0, 0, 1, 1], [], []>} : vector<16x32xbf16>, vector<32x64xbf16>, vector<16x64xf32> -> vector<16x64xf32>
      %180 = arith.addf %177, %179 : vector<16x64xf32>
      %c16 = arith.constant 16 : index
      %c0_98 = arith.constant 0 : index
      %181 = vector.load %arg20[%c16, %c0_98] : memref<32x64xf32, #tpu.memory_space<vmem>>, vector<16x64xf32>
      tpu.vector_store %arg20[%c16, %c0_98], %180 {strides = array<i32>} : memref<32x64xf32, #tpu.memory_space<vmem>>, vector<16x64xf32>,
      %c0_99 = arith.constant 0 : index
      %c0_100 = arith.constant 0 : index
      %182 = vector.load %arg20[%c0_99, %c0_100] : memref<32x64xf32, #tpu.memory_space<vmem>>, vector<32x64xf32>
      %183 = vector.shape_cast %182 : vector<32x64xf32> to vector<1x32x64xf32>
      %cst_101 = arith.constant dense<0.000000e+00> : vector<1xf32>
      %184 = vector.multi_reduction <add>, %183, %cst_101 [1, 2] : vector<1x32x64xf32> to vector<1xf32>
      %185 = vector.shape_cast %184 : vector<1xf32> to vector<1x1x1xf32>
      %186 = vector.extract %185[0, 0, 0] : f32 from vector<1x1x1xf32>
      %cst_102 = arith.constant 2.048000e+03 : f32
      %187 = arith.divf %186, %cst_102 : f32
      %188 = arith.mulf %182, %182 : vector<32x64xf32>
      %189 = vector.shape_cast %188 : vector<32x64xf32> to vector<1x32x64xf32>
      %cst_103 = arith.constant dense<0.000000e+00> : vector<1xf32>
      %190 = vector.multi_reduction <add>, %189, %cst_103 [1, 2] : vector<1x32x64xf32> to vector<1xf32>
      %191 = vector.shape_cast %190 : vector<1xf32> to vector<1x1x1xf32>
      %192 = vector.extract %191[0, 0, 0] : f32 from vector<1x1x1xf32>
      %cst_104 = arith.constant 2.048000e+03 : f32
      %193 = arith.divf %192, %cst_104 : f32
      %194 = arith.mulf %187, %187 : f32
      %195 = arith.subf %193, %194 : f32
      %196 = vector.broadcast %187 : f32 to vector<32x64xf32>
      %197 = arith.subf %182, %196 : vector<32x64xf32>
      %cst_105 = arith.constant 9.99999974E-6 : f32
      %198 = arith.addf %195, %cst_105 : f32
      %199 = math.rsqrt %198 : f32
      %200 = vector.broadcast %199 : f32 to vector<32x64xf32>
      %201 = arith.mulf %197, %200 : vector<32x64xf32>
      %cst_106 = arith.constant 0.000000e+00 : f32
      %202 = vector.broadcast %cst_106 : f32 to vector<32x64xf32>
      %203 = arith.maximumf %201, %202 : vector<32x64xf32>
      %204 = arith.truncf %203 : vector<32x64xf32> to vector<32x64xbf16>
      %cst_107 = arith.constant dense<0.000000e+00> : vector<32x32xf32>
      %205 = tpu.matmul %204, %79, %cst_107 {dimension_numbers = #tpu.dot_dimension_numbers<[1], [0], [0], [1], [0, 0, 1, 1], [], []>} : vector<32x64xbf16>, vector<64x32xbf16>, vector<32x32xf32> -> vector<32x32xf32>
      %cst_108 = arith.constant 1.000000e-01 : f32
      %206 = vector.broadcast %cst_108 : f32 to vector<32x32xf32>
      %207 = arith.mulf %206, %205 : vector<32x32xf32>
      %208 = arith.addf %80, %207 : vector<32x32xf32>
      %c0_109 = arith.constant 0 : index
      %c0_110 = arith.constant 0 : index
      %209 = vector.load %arg17[%c0_109, %c0_110] : memref<32x32xf32, #tpu.memory_space<vmem>>, vector<32x32xf32>
      tpu.vector_store %arg17[%c0_109, %c0_110], %208 {strides = array<i32>} : memref<32x32xf32, #tpu.memory_space<vmem>>, vector<32x32xf32>,
      %cst_111 = arith.constant 1.000000e-01 : f32
      %210 = vector.broadcast %cst_111 : f32 to vector<48x32xf32>
      %211 = arith.mulf %210, %139 : vector<48x32xf32>
      %212 = arith.addf %81, %211 : vector<48x32xf32>
      %c0_112 = arith.constant 0 : index
      %c0_113 = arith.constant 0 : index
      %213 = vector.load %arg18[%c0_112, %c0_113] : memref<48x32xf32, #tpu.memory_space<vmem>>, vector<48x32xf32>
      tpu.vector_store %arg18[%c0_112, %c0_113], %212 {strides = array<i32>} : memref<48x32xf32, #tpu.memory_space<vmem>>, vector<48x32xf32>,
    }
    %c2_i32_38 = arith.constant 2 : i32
    %c0_39 = arith.constant 0 : index
    %c0_40 = arith.constant 0 : index
    %61 = vector.load %arg17[%c0_39, %c0_40] : memref<32x32xf32, #tpu.memory_space<vmem>>, vector<32x32xf32>
    %62 = arith.truncf %61 : vector<32x32xf32> to vector<32x32xbf16>
    %c0_41 = arith.constant 0 : index
    %c0_42 = arith.constant 0 : index
    %63 = vector.load %arg10[%c0_41, %c0_42] : memref<32x128xbf16, #tpu.memory_space<vmem>>, vector<32x128xbf16>
    %cst_43 = arith.constant dense<0.000000e+00> : vector<32x128xf32>
    %64 = tpu.matmul %62, %63, %cst_43 {dimension_numbers = #tpu.dot_dimension_numbers<[1], [0], [0], [1], [0, 0, 1, 1], [], []>} : vector<32x32xbf16>, vector<32x128xbf16>, vector<32x128xf32> -> vector<32x128xf32>
    %c0_44 = arith.constant 0 : index
    %c0_45 = arith.constant 0 : index
    %65 = vector.load %arg15[%c0_44, %c0_45] : memref<32x128xf32, #tpu.memory_space<vmem>>, vector<32x128xf32>
    tpu.vector_store %arg15[%c0_44, %c0_45], %64 {strides = array<i32>} : memref<32x128xf32, #tpu.memory_space<vmem>>, vector<32x128xf32>,
    %c0_46 = arith.constant 0 : index
    %c0_47 = arith.constant 0 : index
    %66 = vector.load %arg18[%c0_46, %c0_47] : memref<48x32xf32, #tpu.memory_space<vmem>>, vector<48x32xf32>
    %c0_48 = arith.constant 0 : index
    %c0_49 = arith.constant 0 : index
    %67 = vector.load %arg16[%c0_48, %c0_49] : memref<48x32xf32, #tpu.memory_space<vmem>>, vector<48x32xf32>
    tpu.vector_store %arg16[%c0_48, %c0_49], %66 {strides = array<i32>} : memref<48x32xf32, #tpu.memory_space<vmem>>, vector<48x32xf32>,
    return
  }
}

</mosaic_0001>

<bundles_post_ra>
// kernel: tpu_custom_call.1
= control target key start
LH: loop header
LB: loop body
LE: loop exit
PB: predicated region body
PF: predicated region fallthrough
CT: control target
= control target key end

     0   :  { %s3410_s0 = inlined_call_operand.vmem [shape: bf16[32,4], index: 0, kind: input, shape index: {}]   ;;  %s3411_s1 = inlined_call_operand.vmem [shape: bf16[48,5], index: 1, kind: input, shape index: {}]   ;;  %s3412_s2 = inlined_call_operand.vmem [shape: bf16[4,32], index: 2, kind: input, shape index: {}]   ;;  %s3413_s3 = inlined_call_operand.vmem [shape: bf16[32,32], index: 3, kind: input, shape index: {}]   ;;  %s3414_s4 = inlined_call_operand.vmem [shape: bf16[5,32], index: 4, kind: input, shape index: {}]   ;;  %s3415_s5 = inlined_call_operand.vmem [shape: bf16[32,32], index: 5, kind: input, shape index: {}]   ;;  %s3416_s6 = inlined_call_operand.vmem [shape: bf16[2,96,64], index: 6, kind: input, shape index: {}]   ;;  %s3417_s7 = inlined_call_operand.vmem [shape: bf16[2,64,32], index: 7, kind: input, shape index: {}]   ;;  %s3418_s8 = inlined_call_operand.vmem [shape: bf16[2,96,64], index: 8, kind: input, shape index: {}]   ;;  %s3419_s9 = inlined_call_operand.vmem [shape: bf16[2,64,32], index: 9, kind: input, shape index: {}]   ;;  %s3420_s10 = inlined_call_operand.vmem [shape: bf16[32,128], index: 10, kind: input, shape index: {}]   ;;  %s3421_s11 = inlined_call_operand.vmem [shape: bf16[24,16], index: 11, kind: input, shape index: {}]   ;;  %s3422_s12 = inlined_call_operand.vmem [shape: bf16[24,16], index: 12, kind: input, shape index: {}]   ;;  %s3423_s13 = inlined_call_operand.vmem [shape: bf16[16,24], index: 13, kind: input, shape index: {}]   ;;  %s3424_s14 = inlined_call_operand.vmem [shape: bf16[16,24], index: 14, kind: input, shape index: {}]   ;;  %s3425_s15 = inlined_call_operand.hbm [shape: f32[32,128], index: 15, kind: output, shape index: {0}]   ;;  %s3426_s16 = inlined_call_operand.vmem [shape: f32[48,32], index: 16, kind: output, shape index: {1}]  }
   0x1   :  { %3428 = sst [smem:[#allocation9_spill]] %s3410_s0 }
   0x2   :  { %22 = vsyncpa [#allocation7], 0  ;;  %v58_v0 = vld [vmem:[%s3412_s2] sm:$0x3]  ;;  %vm80_vm0 = vcmask 1041408   ;;  %vm305_vm1 = vcmask 1042432  }
   0x3   :  { %2673 = vmatprep.subr.msk.bf16.mxu0 %vm80_vm0, %v58_v0  ;;  %v275_v1 = vld [vmem:[%s3414_s4] sm:$0x7]  ;;  %v82_v2 = vsel %vm80_vm0, %v58_v0, 0  ;;  %v2787_v3 = vmov 65535   ;;  %s3429_s27 = sld [smem:[#allocation9_spill]]  ;;  %vm73_vm2 = vcmask 31744  }
   0x4   :  { %v306_v4 = vsel %vm80_vm0, 4294967295, %v2787_v3  ;;  %2406 = vmatpush3.bf16.msra.mxu0 %v82_v2  ;;  %v2788_v9 = vmov 0.0   ;;  %vm2789_vm3 = vmmov 0   ;;  %v2716_v10 = vld [vmem:[%s3411_s1] sm:$0xff]   ;;  %vm295_vm4 = vcmask 39936   ;;  %v2717_v11 = vld [vmem:[%s3411_s1 + $0x8] sm:$0xff]  }
   0x5   :  { %v307_v7 = vsel %vm305_vm1, %v306_v4, 0  ;;  %2419 = vmatprep.subr.bf16.mxu0 %v2788_v9  ;;  %v2718_v12 = vld [vmem:[%s3411_s1 + $0x10] sm:$0xff]   ;;  %vm133_vm5 = vcmask 261120  }
   0x6   :  { %v309_v8 = vand.u32 %v307_v7, %v275_v1 }
   0x9   :  { %v2714_v5 = vld [vmem:[%s3429_s27] sm:$0xff]   ;;  %v2715_v6 = vld [vmem:[%s3429_s27 + $0x8] sm:$0xff]  }
   0xa   :  { %2407 = vmatprep.mubr.msk.bf16.mxu0 %vm73_vm2, %v2714_v5 }
   0xb   :  { %2408 = vmatmul.mubr.msk.bf16.vlgmr.msra.gmra.mrb[0].mxu0 %vm73_vm2, %v2715_v6 }
   0xc   :  { %2420 = vmatpush3.bf16.msra.mxu0 %v309_v8  ;;  %2421 = vmatprep.mubr.msk.bf16.mxu0 %vm2789_vm3, %v2788_v9 }
  0x13   :  { %2422 = vmatmul.mubr.msk.bf16.vlgmr.msra.gmra.mrb[4].mxu0 %vm295_vm4, %v2716_v10 }
  0x14   :  { %2425 = vmatprep.mubr.msk.bf16.mxu0 %vm2789_vm3, %v2788_v9 }
  0x1b   :  { %2426 = vmatmul.mubr.msk.bf16.gmra.mrb[8].mxu0 %vm295_vm4, %v2717_v11 }
  0x1c   :  { %2429 = vmatprep.mubr.msk.bf16.mxu0 %vm2789_vm3, %v2788_v9 }
  0x23   :  { %2430 = vmatmul.mubr.msk.bf16.gmra.mrb[12].mxu0 %vm295_vm4, %v2718_v12 }
  0xde   :  { %v2908_v13 = vpop.f32.mrb[0].mxu0 }
  0xdf   :  { %v2910_v14 = vpop.f32.mrb[1].mxu0  ;;  %v155_v18 = vmul.f32 %v2908_v13, %v2908_v13  ;;  %v137_v26 = vsel %vm133_vm5, %v2908_v13, 0.0 }
  0xe0   :  { %v153_v15 = vmul.f32 %v2910_v14, %v2910_v14  ;;  %v2914_v16 = vpop.f32.mrb[2].mxu0  ;;  %v134_v19 = vsel %vm133_vm5, %v2910_v14, 0.0 }
  0xe1   :  { %v2916_v17 = vpop.f32.mrb[3].mxu0  ;;  %v156_v24 = vmul.f32 %v2914_v16, %v2914_v16  ;;  %v139_v29 = vsel %vm133_vm5, %v2914_v16, 0.0  ;;  %v160_v30 = vsel %vm133_vm5, %v155_v18, 0.0 }
  0xe2   :  { %v135_v20 = vsel %vm133_vm5, %v2916_v17, 0.0  ;;  %v154_v21 = vmul.f32 %v2916_v17, %v2916_v17  ;;  %v157_v23 = vsel %vm133_vm5, %v153_v15, 0.0 }
  0xe3   :  { %v136_v22 = vadd.f32 %v135_v20, %v134_v19  ;;  %v162_v37 = vsel %vm133_vm5, %v156_v24, 0.0  ;;  %v2719_v24 = vld [vmem:[%s3413_s3] sm:$0xff]  }
  0xe4   :  { %v158_v25 = vsel %vm133_vm5, %v154_v21, 0.0  ;;  %2411 = vmatprep.subr.bf16.mxu1 %v2719_v24 }
  0xe5   :  { %v138_v27 = vadd.f32 %v137_v26, %v136_v22  ;;  %v159_v28 = vadd.f32 %v158_v25, %v157_v23  ;;  %2412 = vmatpush3.bf16.msra.mxu1 %v2719_v24 }
  0xe6   :  { %v2935_v31 = vpop.f32.mrb[4].mxu0 }
  0xe7   :  { %v140_v32 = vadd.f32 %v139_v29, %v138_v27  ;;  %v161_v33 = vadd.f32 %v160_v30, %v159_v28  ;;  %v368_v34 = vsel %vm133_vm5, %v2935_v31, 0.0  ;;  %v391_v35 = vmul.f32 %v2935_v31, %v2935_v31  ;;  %v2423_v36 = vpop.f32.mrb[5].mxu0  ;;  %v2720_v29 = vld [vmem:[%s3413_s3 + $0x8] sm:$0xff]  }
  0xe8   :  { %v2942_v38 = vpop.f32.mrb[6].mxu0  ;;  %2413 = vmatprep.subr.bf16.mxu1 %v2720_v29 }
  0xe9   :  { %141 = vadd.xlane.f32.xlu0 %v140_v32  ;;  %v163_v39 = vadd.f32 %v162_v37, %v161_v33  ;;  %v397_v40 = vsel %vm133_vm5, %v391_v35, 0.0  ;;  %v369_v41 = vsel %vm133_vm5, %v2942_v38, 0.0  ;;  %v392_v42 = vmul.f32 %v2942_v38, %v2942_v38  ;;  %v2424_v43 = vpop.f32.mrb[7].mxu0  ;;  %2414 = vmatpush3.bf16.msra.mxu1 %v2720_v29  ;;  %v3021_v29 = vld [vmem:[%s3421_s11 + $0x4] sm:$0xf] }
  0xea   :  { %v370_v44 = vadd.f32 %v369_v41, %v368_v34  ;;  %2433 = vmatprep.subr.bf16.mxu1 %v2788_v9 }
  0xeb   :  { %v398_v45 = vsel %vm133_vm5, %v392_v42, 0.0 }
  0xec   :  { %v399_v46 = vadd.f32 %v398_v45, %v397_v40 }
  0xed   :  { %164 = vadd.xlane.f32.xlu0 %v163_v39 }
  0xee   :  { %v2950_v47 = vpop.f32.mrb[8].mxu0 }
  0xef   :  { %v371_v48 = vsel %vm133_vm5, %v2950_v47, 0.0  ;;  %v393_v49 = vmul.f32 %v2950_v47, %v2950_v47  ;;  %v2427_v50 = vpop.f32.mrb[9].mxu0 }
  0xf0   :  { %v372_v51 = vadd.f32 %v371_v48, %v370_v44  ;;  %v2956_v52 = vpop.f32.mrb[10].mxu0 }
  0xf1   :  { %v400_v53 = vsel %vm133_vm5, %v393_v49, 0.0  ;;  %v373_v54 = vsel %vm133_vm5, %v2956_v52, 0.0  ;;  %v394_v55 = vmul.f32 %v2956_v52, %v2956_v52  ;;  %v2428_v56 = vpop.f32.mrb[11].mxu0 }
  0xf2   :  { %v401_v57 = vadd.f32 %v400_v53, %v399_v46  ;;  %v374_v58 = vadd.f32 %v373_v54, %v372_v51 }
  0xf3   :  { %v402_v59 = vsel %vm133_vm5, %v394_v55, 0.0 }
  0xf4   :  { %v403_v60 = vadd.f32 %v402_v59, %v401_v57 }
  0xf6   :  { %v2964_v61 = vpop.f32.mrb[12].mxu0 }
  0xf7   :  { %v395_v62 = vmul.f32 %v2964_v61, %v2964_v61  ;;  %v2431_v63 = vpop.f32.mrb[13].mxu0  ;;  %v375_v0 = vsel %vm133_vm5, %v2964_v61, 0.0 }
  0xf8   :  { %v2970_v1 = vpop.f32.mrb[14].mxu0  ;;  %v376_v2 = vadd.f32 %v375_v0, %v374_v58 }
  0xf9   :  { %v396_v3 = vmul.f32 %v2970_v1, %v2970_v1  ;;  %v377_v4 = vsel %vm133_vm5, %v2970_v1, 0.0  ;;  %v404_v5 = vsel %vm133_vm5, %v395_v62, 0.0  ;;  %v2432_v6 = vpop.f32.mrb[15].mxu0 }
  0xfa   :  { %v378_v7 = vadd.f32 %v377_v4, %v376_v2  ;;  %v405_v8 = vadd.f32 %v404_v5, %v403_v60 }
  0xfb   :  { %v406_v10 = vsel %vm133_vm5, %v396_v3, 0.0 }
  0xfc   :  { %379 = vadd.xlane.f32.xlu1 %v378_v7  ;;  %v407_v11 = vadd.f32 %v406_v10, %v405_v8  ;;  %v2721_v10 = vld [vmem:[%s3415_s5] sm:$0xff]  }
 0x100   :  { %408 = vadd.xlane.f32.xlu1 %v407_v11 }
 0x176   :  { %v142_v12 = vpop.xlane.xlu0 %141 }
 0x177   :  { %v143_v15 = vrot.slane %v142_v12, 4 }
 0x179   :  { %v144_v18 = vadd.f32 %v143_v15, %v142_v12 }
 0x17a   :  { %v165_v19 = vpop.xlane.xlu0 %164 }
 0x17b   :  { %v145_v20 = vrot.slane %v144_v18, 2  ;;  %v166_v21 = vrot.slane %v165_v19, 4 }
 0x17d   :  { %v167_v22 = vadd.f32 %v166_v21, %v165_v19  ;;  %v146_v23 = vadd.f32 %v145_v20, %v144_v18 }
 0x17f   :  { %v168_v25 = vrot.slane %v167_v22, 2  ;;  %v147_v26 = vrot.slane %v146_v23, 1 }
 0x181   :  { %v169_v27 = vadd.f32 %v168_v25, %v167_v22  ;;  %v148_v28 = vadd.f32 %v147_v26, %v146_v23 }
 0x183   :  { %2674 = vpush %v148_v28  ;;  %v170_v30 = vrot.slane %v169_v27, 1  ;;  %v3016_v28 = vld [vmem:[%s3421_s11] sm:$0xf] }
 0x185   :  { %v171_v32 = vadd.f32 %v170_v30, %v169_v27  ;;  %v3026_v30 = vld [vmem:[%s3421_s11 + $0x8] sm:$0xf] }
 0x187   :  { %2676 = vpush %v171_v32  ;;  %v3036_v32 = vld [vmem:[%s3422_s12 + $0x4] sm:$0xf] }
 0x189   :  { %v380_v33 = vpop.xlane.xlu1 %379 }
 0x18a   :  { %v381_v35 = vrot.slane %v380_v33, 4 }
 0x18c   :  { %v382_v43 = vadd.f32 %v381_v35, %v380_v33  ;;  %v3041_v33 = vld [vmem:[%s3422_s12 + $0x8] sm:$0xf]  ;;  %v3051_v35 = vld [vmem:[%s3423_s13 + $0x4] sm:$0xf] }
 0x18d   :  { %v409_v34 = vpop.xlane.xlu1 %408 }
 0x18e   :  { %v410_v36 = vrot.slane %v409_v34, 4  ;;  %v383_v45 = vrot.slane %v382_v43, 2 }
 0x190   :  { %v411_v44 = vadd.f32 %v410_v36, %v409_v34  ;;  %v384_v49 = vadd.f32 %v383_v45, %v382_v43  ;;  %v3046_v34 = vld [vmem:[%s3423_s13] sm:$0xf] }
 0x191   :  { %v3056_v36 = vld [vmem:[%s3424_s14] sm:$0xf] }
 0x192   :  { %v412_v46 = vrot.slane %v411_v44, 2  ;;  %v385_v51 = vrot.slane %v384_v49, 1 }
 0x194   :  { %v413_v50 = vadd.f32 %v412_v46, %v411_v44  ;;  %v386_v54 = vadd.f32 %v385_v51, %v384_v49 }
 0x196   :  { %v414_v53 = vrot.slane %v413_v50, 1 }
 0x1b4   :  { %s2675_s22 = spop %2674 }
 0x1b5   :  { %s152_s23 = smul.f32 0.0009765625, %s2675_s22 }
 0x1b7   :  { %v178_v37 = vstv %s152_s23  ;;  %s176_s24 = smul.f32 %s152_s23, %s152_s23 }
 0x1b8   :  { %s2677_s25 = spop %2676  ;;  %v181_v39 = vsub.f32 %v2908_v13, %v178_v37  ;;  %v182_v40 = vsub.f32 %v2914_v16, %v178_v37  ;;  %v179_v41 = vsub.f32 %v2910_v14, %v178_v37  ;;  %v180_v42 = vsub.f32 %v2916_v17, %v178_v37  ;;  %v3061_v37 = vld [vmem:[%s3424_s14 + $0x4] sm:$0xf] }
 0x1b9   :  { %s175_s3 = smul.f32 0.0009765625, %s2677_s25  ;;  %v415_v16 = vadd.f32 %v414_v53, %v413_v50 }
 0x1bb   :  { %s177_s26 = ssub.f32 %s175_s3, %s176_s24 }
 0x1bd   :  { %s183_s27 = sadd.f32 1e-05, %s177_s26 }
 0x1bf   :  { %v184_v48 = vstv %s183_s27 }
 0x1c0   :  { %2723 = vrsqrt.f32 %v184_v48 }
 0x1ca   :  { %v2724_v13 = vpop.eup %2723 }
 0x1cb   :  { %2678 = vpush %v2724_v13 }
 0x1cc   :  { %2680 = vpush %v386_v54 }
 0x1cd   :  { %2682 = vpush %v415_v16 }
 0x1fc   :  { %s2679_s28 = spop %2678 }
 0x1fd   :  { %v187_v14 = vstv %s2679_s28  ;;  %s2681_s29 = spop %2680 }
 0x1fe   :  { %v190_v17 = vmul.f32 %v187_v14, %v181_v39  ;;  %v191_v55 = vmul.f32 %v187_v14, %v182_v40  ;;  %s390_s2 = smul.f32 0.0006510417, %s2681_s29  ;;  %s2683_s4 = spop %2682  ;;  %v188_v56 = vmul.f32 %v187_v14, %v179_v41  ;;  %v189_v57 = vmul.f32 %v187_v14, %v180_v42 }
 0x1ff   :  { %s419_s30 = smul.f32 0.0006510417, %s2683_s4 }
 0x200   :  { %v194_v58 = vmax.f32 %v190_v17, 0.0  ;;  %v195_v59 = vmax.f32 %v191_v55, 0.0  ;;  %s420_s0 = smul.f32 %s390_s2, %s390_s2  ;;  %v422_v60 = vstv %s390_s2  ;;  %v192_v62 = vmax.f32 %v188_v56, 0.0 }
 0x201   :  { %v193_v63 = vmax.f32 %v189_v57, 0.0  ;;  %v423_v0 = vsub.f32 %v2935_v31, %v422_v60  ;;  %v424_v2 = vsub.f32 %v2942_v38, %v422_v60  ;;  %v425_v3 = vsub.f32 %v2950_v47, %v422_v60  ;;  %v2722_v38 = vld [vmem:[%s3415_s5 + $0x8] sm:$0xff]  }
 0x202   :  { %v197_v4 = vpack.c.bf16 %v195_v59, %v194_v58  ;;  %s421_s17 = ssub.f32 %s419_s30, %s420_s0  ;;  %v426_v5 = vsub.f32 %v2956_v52, %v422_v60  ;;  %v427_v6 = vsub.f32 %v2964_v61, %v422_v60  ;;  %v428_v7 = vsub.f32 %v2970_v1, %v422_v60 }
 0x203   :  { %v196_v8 = vpack.c.bf16 %v193_v63, %v192_v62 }
 0x204   :  { %s429_s19 = sadd.f32 1e-05, %s421_s17 }
 0x205   :  { %2415 = vmatprep.mubr.msk.bf16.mxu1 %vm133_vm5, %v196_v8 }
 0x206   :  { %v430_v31 = vstv %s429_s19  ;;  %2416 = vmatmul.mubr.msk.bf16.vlgmr.msra.gmra.mrb[0].mxu1 %vm133_vm5, %v197_v4 }
 0x207   :  { %2725 = vrsqrt.f32 %v430_v31  ;;  %2434 = vmatpush3.bf16.msra.mxu1 %v2721_v10  ;;  %2437 = vmatprep.mubr.msk.bf16.mxu1 %vm2789_vm3, %v2788_v9 }
 0x208   :  { %2435 = vmatprep.subr.bf16.mxu1 %v2788_v9 }
 0x20b   :  { %2436 = vmatpush3.bf16.msra.mxu1 %v2722_v38 }
 0x211   :  { %v2726_v47 = vpop.eup %2725 }
 0x212   :  { %2684 = vpush %v2726_v47 }
 0x243   :  { %s2685_s22 = spop %2684 }
 0x244   :  { %v433_v52 = vstv %s2685_s22 }
 0x245   :  { %v434_v61 = vmul.f32 %v433_v52, %v423_v0  ;;  %v435_v1 = vmul.f32 %v433_v52, %v424_v2  ;;  %v436_v11 = vmul.f32 %v433_v52, %v425_v3  ;;  %v437_v12 = vmul.f32 %v433_v52, %v426_v5 }
 0x246   :  { %v438_v15 = vmul.f32 %v433_v52, %v427_v6  ;;  %v439_v18 = vmul.f32 %v433_v52, %v428_v7 }
 0x247   :  { %v440_v19 = vmax.f32 %v434_v61, 0.0  ;;  %v441_v20 = vmax.f32 %v435_v1, 0.0  ;;  %v442_v21 = vmax.f32 %v436_v11, 0.0  ;;  %v443_v22 = vmax.f32 %v437_v12, 0.0 }
 0x248   :  { %v444_v23 = vmax.f32 %v438_v15, 0.0  ;;  %v445_v24 = vmax.f32 %v439_v18, 0.0 }
 0x249   :  { %v446_v25 = vpack.c.bf16 %v441_v20, %v440_v19  ;;  %v447_v26 = vpack.c.bf16 %v443_v22, %v442_v21 }
 0x24a   :  { %v448_v27 = vpack.c.bf16 %v445_v24, %v444_v23 }
 0x24b   :  { %2438 = vmatmul.mubr.msk.bf16.vlgmr.msra.gmra.mrb[4].mxu1 %vm133_vm5, %v446_v25 }
 0x24c   :  { %2441 = vmatprep.mubr.msk.bf16.mxu1 %vm2789_vm3, %v2788_v9 }
 0x253   :  { %2442 = vmatmul.mubr.msk.bf16.gmra.mrb[8].mxu1 %vm133_vm5, %v447_v26 }
 0x254   :  { %2445 = vmatprep.mubr.msk.bf16.mxu1 %vm2789_vm3, %v2788_v9  ;;  %v3031_v9 = vld [vmem:[%s3422_s12] sm:$0xf]  ;;  %s3073_s12 = smov 0  }
 0x25b   :  { %2446 = vmatmul.mubr.msk.bf16.gmra.mrb[12].mxu1 %vm133_vm5, %v448_v27 }
 0x2d9   :  { %v2417_v39 = vpop.f32.mrb[0].mxu1 }
 0x2da   :  { %267 = vst.msk [vmem:[#allocation2 + $0x10] sm:$0xff] %vm133_vm5, %v2417_v39  ;;  %v250_v40 = vpop.f32.mrb[1].mxu1 }
 0x2db   :  { %265 = vst.msk [vmem:[#allocation2] sm:$0xff] %vm133_vm5, %v250_v40  ;;  %v2418_v41 = vpop.f32.mrb[2].mxu1 }
 0x2dc   :  { %268 = vst.msk [vmem:[#allocation2 + $0x18] sm:$0xff] %vm133_vm5, %v2418_v41  ;;  %v253_v42 = vpop.f32.mrb[3].mxu1 }
 0x2dd   :  { %266 = vst.msk [vmem:[#allocation2 + $0x8] sm:$0xff] %vm133_vm5, %v253_v42 }
 0x31e   :  { %v504_v43 = vpop.f32.mrb[4].mxu1 }
 0x31f   :  { %527 = vst.msk [vmem:[#allocation3] sm:$0xff] %vm133_vm5, %v504_v43  ;;  %v2439_v44 = vpop.f32.mrb[5].mxu1 }
 0x320   :  { %v507_v45 = vpop.f32.mrb[6].mxu1 }
 0x321   :  { %528 = vst.msk [vmem:[#allocation3 + $0x8] sm:$0xff] %vm133_vm5, %v507_v45  ;;  %v2440_v46 = vpop.f32.mrb[7].mxu1 }
 0x326   :  { %v512_v48 = vpop.f32.mrb[8].mxu1 }
 0x327   :  { %529 = vst.msk [vmem:[#allocation3 + $0x10] sm:$0xff] %vm133_vm5, %v512_v48  ;;  %v2443_v49 = vpop.f32.mrb[9].mxu1 }
 0x328   :  { %v515_v50 = vpop.f32.mrb[10].mxu1 }
 0x329   :  { %530 = vst.msk [vmem:[#allocation3 + $0x18] sm:$0xff] %vm133_vm5, %v515_v50  ;;  %v2444_v51 = vpop.f32.mrb[11].mxu1 }
 0x32e   :  { %v520_v53 = vpop.f32.mrb[12].mxu1 }
 0x32f   :  { %531 = vst.msk [vmem:[#allocation3 + $0x20] sm:$0xff] %vm133_vm5, %v520_v53  ;;  %v2447_v13 = vpop.f32.mrb[13].mxu1 }
 0x330   :  { %v523_v54 = vpop.f32.mrb[14].mxu1 }
 0x331   :  { %532 = vst.msk [vmem:[#allocation3 + $0x28] sm:$0xff] %vm133_vm5, %v523_v54  ;;  %v2448_v16 = vpop.f32.mrb[15].mxu1 }
 0x332 LB: > { %v599_v14 = vld [vmem:[#allocation2] sm:$0xff]  ;;  %v600_v17 = vld [vmem:[#allocation2 + $0x8] sm:$0xff]  ;;  %vm618_vm6 = vcmask 130048   ;;  %v2241_v55 = vcombine.low %v3031_v9, %v3036_v32  ;;  %v3080_v56 = vld [vmem:[#allocation2 + $0x10] sm:$0xff]  ;;  %v2237_v57 = vcombine.low %v3016_v28, %v3021_v29  ;;  %s2302_s13 = smul.u32 48, %s2785_s12  ;;  %v2242_v62 = vcombine.low %v3041_v33, %v3041_v33  ;;  %s2303_s23 = sshll.u32 %s2785_s12, 5  ;;  %s2785_s12 = sphi %s3073_s12, %s548_s12  }
 0x333   : > { %v3084_v58 = vpack.c.bf16 %v600_v17, %v599_v14  ;;  %v3086_v59 = vld [vmem:[#allocation2 + $0x18] sm:$0xff]  ;;  %v2238_v63 = vcombine.low %v3026_v30, %v3026_v30  ;;  %v3128_v21 = vld [vmem:[#allocation3] sm:$0xff]  ;;  %v3130_v22 = vld [vmem:[#allocation3 + $0x8] sm:$0xff]  ;;  %vm942_vm7 = vcmask 523264   ;;  %s566_s3 = scalar_lea.vmem %s3417_s7, %s2303_s23  ;;  %vm2791_vm8 = vmmov 0   ;;  %s590_s20 = scalar_lea.vmem %s3419_s9, %s2303_s23 }
 0x334   : > { %2457 = vmatprep.mubr.msk.bf16.mxu1 %vm618_vm6, %v2241_v55  ;;  %v3091_v60 = vpack.c.bf16 %v3086_v59, %v3080_v56  ;;  %2451 = vmatprep.mubr.msk.bf16.mxu0 %vm618_vm6, %v2237_v57  ;;  %s3106_s5 = scalar_lea.vmem %s3416_s6, %s2302_s13  ;;  %v735_v25 = vpack.c.bf16 %v3130_v22, %v3128_v21  ;;  %v3140_v43 = vld [vmem:[#allocation3 + $0x10] sm:$0xff]  ;;  %v3144_v45 = vld [vmem:[#allocation3 + $0x18] sm:$0xff]  ;;  %vm1405_vm9 = vcmask 1043456   ;;  %vm1401_vm10 = vcmask 195584   ;;  %s3280_s18 = scalar_lea.vmem %s3418_s8, %s2302_s13 }
 0x335   : > { %2455 = vmatprep.subr.bf16.mxu1 %v3084_v58  ;;  %2449 = vmatprep.subr.bf16.mxu0 %v3084_v58  ;;  %v2727_v0 = vld [vmem:[%s3106_s5 + $0x10] sm:$0xff]   ;;  %v2728_v2 = vld [vmem:[%s3106_s5 + $0x18] sm:$0xff]   ;;  %v2729_v3 = vld [vmem:[%s3106_s5] sm:$0xff]   ;;  %v736_v44 = vpack.c.bf16 %v3140_v43, %v3140_v43  ;;  %s548_s12 = sadd.s32 1, %s2785_s12  }
 0x336   : > { %2456 = vmatpush3.bf16.msra.mxu1 %v3084_v58  ;;  %2450 = vmatpush3.bf16.msra.mxu0 %v3084_v58  ;;  %v2730_v1 = vld [vmem:[%s3106_s5 + $0x8] sm:$0xff]   ;;  %v2731_v15 = vld [vmem:[%s3106_s5 + $0x20] sm:$0xff]   ;;  %p545_p0 = scmp.ge.s32.totalorder %s548_s12, 2  }
 0x337   : > { %2485 = vmatprep.subr.bf16.mxu1 %v3091_v60  ;;  %2461 = vmatprep.subr.bf16.mxu0 %v2727_v0  ;;  %v2732_v27 = vld [vmem:[%s3106_s5 + $0x28] sm:$0xff]   ;;  %v3146_v46 = vld [vmem:[#allocation3 + $0x20] sm:$0xff]  ;;  %s2792_s11 = smov (%p545_p0), [#allocation6]  }
 0x338   : > { %v1043_v48 = vpack.c.bf16 %v3146_v46, %v3144_v45  ;;  %v3153_v50 = vld [vmem:[#allocation3 + $0x28] sm:$0xff] }
 0x339   : > { %2458 = vmatmul.mubr.msk.bf16.vlgmr.msra.gmra.mrb[0].mxu1 %vm618_vm6, %v2242_v62  ;;  %2452 = vmatmul.mubr.msk.bf16.vlgmr.msra.gmra.mrb[0].mxu0 %vm618_vm6, %v2238_v63  ;;  %v1044_v51 = vpack.c.bf16 %v3153_v50, %v3153_v50 }
 0x33a   : > { %2486 = vmatpush3.bf16.msra.mxu1 %v3091_v60  ;;  %2487 = vmatprep.mubr.msk.bf16.mxu1 %vm618_vm6, %v2237_v57 }
 0x33b   : > { %2491 = vmatprep.subr.bf16.mxu1 %v3091_v60  ;;  %2462 = vmatpush3.bf16.msra.mxu0 %v2727_v0 }
 0x33c   : > { %2463 = vmatprep.subr.bf16.mxu0 %v2728_v2 }
 0x33f   : > { %2464 = vmatpush3.bf16.msra.mxu0 %v2728_v2 }
 0x340   : > { %2469 = vmatprep.subr.bf16.mxu0 %v2729_v3 }
 0x341   : > { %2488 = vmatmul.mubr.msk.bf16.vlgmr.msra.gmra.mrb[4].mxu1 %vm618_vm6, %v2238_v63 }
 0x342   : > { %2492 = vmatpush3.bf16.msra.mxu1 %v3091_v60  ;;  %2493 = vmatprep.mubr.msk.bf16.mxu1 %vm618_vm6, %v2241_v55 }
 0x343   : > { %2497 = vmatprep.subr.bf16.mxu1 %v2727_v0 }
 0x349   : > { %2494 = vmatmul.mubr.msk.bf16.vlgmr.msra.gmra.mrb[8].mxu1 %vm618_vm6, %v2242_v62 }
 0x34a   : > { %2498 = vmatpush3.bf16.msra.mxu1 %v2727_v0 }
 0x34b   : > { %2499 = vmatprep.subr.bf16.mxu1 %v2728_v2 }
 0x34e   : > { %2500 = vmatpush3.bf16.msra.mxu1 %v2728_v2 }
 0x34f   : > { %2505 = vmatprep.subr.bf16.mxu1 %v2729_v3 }
 0x40c   : > { %v2459_v4 = vpop.f32.mrb[0].mxu1  ;;  %v2453_v5 = vpop.f32.mrb[0].mxu0 }
 0x40d   : > { %v721_v6 = vpop.f32.mrb[1].mxu1  ;;  %v659_v7 = vpop.f32.mrb[1].mxu0  ;;  %v740_v61 = vpack.c.bf16 %v2459_v4, %v2459_v4  ;;  %v738_v23 = vpack.c.bf16 %v2453_v5, %v2453_v5 }
 0x40e   : > { %v2460_v8 = vpop.f32.mrb[2].mxu1  ;;  %v2454_v10 = vpop.f32.mrb[2].mxu0 }
 0x40f   : > { %v724_v31 = vpop.f32.mrb[3].mxu1  ;;  %v662_v38 = vpop.f32.mrb[3].mxu0 }
 0x410   : > { %v739_v47 = vpack.c.bf16 %v724_v31, %v721_v6  ;;  %v737_v52 = vpack.c.bf16 %v662_v38, %v659_v7 }
 0x412   : > { %2465 = vmatprep.mubr.msk.bf16.mxu0 %vm133_vm5, %v739_v47 }
 0x413   : > { %2466 = vmatmul.mubr.msk.bf16.vlgmr.msra.gmra.mrb[4].mxu0 %vm133_vm5, %v740_v61 }
 0x414   : > { %v2489_v11 = vpop.f32.mrb[4].mxu1  ;;  %2470 = vmatpush3.bf16.msra.mxu0 %v2729_v3  ;;  %2473 = vmatprep.mubr.msk.bf16.mxu0 %vm133_vm5, %v737_v52 }
 0x415   : > { %v981_v12 = vpop.f32.mrb[5].mxu1  ;;  %2471 = vmatprep.subr.bf16.mxu0 %v2730_v1  ;;  %v1046_v49 = vpack.c.bf16 %v2489_v11, %v2489_v11 }
 0x416   : > { %v2490_v18 = vpop.f32.mrb[6].mxu1 }
 0x417   : > { %v984_v19 = vpop.f32.mrb[7].mxu1 }
 0x418   : > { %v1045_v20 = vpack.c.bf16 %v984_v19, %v981_v12  ;;  %2472 = vmatpush3.bf16.msra.mxu0 %v2730_v1 }
 0x419   : > { %2477 = vmatprep.subr.bf16.mxu0 %v2731_v15 }
 0x41c   : > { %v2495_v24 = vpop.f32.mrb[8].mxu1 }
 0x41d   : > { %v1029_v26 = vpop.f32.mrb[9].mxu1  ;;  %v1048_v42 = vpack.c.bf16 %v2495_v24, %v2495_v24 }
 0x41e   : > { %v2496_v39 = vpop.f32.mrb[10].mxu1 }
 0x41f   : > { %2474 = vmatmul.mubr.msk.bf16.vlgmr.msra.gmra.mrb[4].mxu0 %vm133_vm5, %v738_v23  ;;  %v1032_v40 = vpop.f32.mrb[11].mxu1 }
 0x420   : > { %v1047_v41 = vpack.c.bf16 %v1032_v40, %v1029_v26  ;;  %2478 = vmatpush3.bf16.msra.mxu0 %v2731_v15  ;;  %2481 = vmatprep.mubr.msk.bf16.mxu0 %vm133_vm5, %v735_v25 }
 0x421   : > { %2479 = vmatprep.subr.bf16.mxu0 %v2732_v27 }
 0x422   : > { %2501 = vmatprep.mubr.msk.bf16.mxu1 %vm133_vm5, %v1047_v41 }
 0x423   : > { %2502 = vmatmul.mubr.msk.bf16.vlgmr.msra.gmra.mrb[12].mxu1 %vm133_vm5, %v1048_v42 }
 0x424   : > { %2506 = vmatpush3.bf16.msra.mxu1 %v2729_v3  ;;  %2509 = vmatprep.mubr.msk.bf16.mxu1 %vm133_vm5, %v1045_v20 }
 0x425   : > { %2480 = vmatpush3.bf16.msra.mxu0 %v2732_v27  ;;  %2507 = vmatprep.subr.bf16.mxu1 %v2730_v1 }
 0x428   : > { %2508 = vmatpush3.bf16.msra.mxu1 %v2730_v1 }
 0x429   : > { %2513 = vmatprep.subr.bf16.mxu1 %v2731_v15 }
 0x42b   : > { %2482 = vmatmul.mubr.msk.bf16.vlgmr.msra.gmra.mrb[4].mxu0 %vm133_vm5, %v736_v44 }
 0x42f   : > { %2510 = vmatmul.mubr.msk.bf16.vlgmr.msra.gmra.mrb[12].mxu1 %vm133_vm5, %v1046_v49  ;;  %v2790_v49 = vmov 0.0  }
 0x430   : > { %2514 = vmatpush3.bf16.msra.mxu1 %v2731_v15  ;;  %2517 = vmatprep.mubr.msk.bf16.mxu1 %vm133_vm5, %v1043_v48 }
 0x431   : > { %2515 = vmatprep.subr.bf16.mxu1 %v2732_v27  ;;  %2521 = vmatprep.subr.bf16.mxu0 %v2790_v49 }
 0x432   : > { %2529 = vmatprep.mubr.msk.bf16.mxu0 %vm2791_vm8, %v2790_v49 }
 0x434   : > { %2516 = vmatpush3.bf16.msra.mxu1 %v2732_v27 }
 0x435   : > { %2541 = vmatprep.subr.bf16.mxu1 %v2790_v49 }
 0x43b   : > { %2518 = vmatmul.mubr.msk.bf16.vlgmr.msra.gmra.mrb[12].mxu1 %vm133_vm5, %v1044_v51  ;;  %v2733_v51 = vld [vmem:[%s566_s3] sm:$0xff]  }
 0x43c   : > { %2522 = vmatpush3.bf16.msra.mxu0 %v2733_v51  ;;  %2545 = vmatprep.mubr.msk.bf16.mxu1 %vm2791_vm8, %v2790_v49 }
 0x43d   : > { %2523 = vmatprep.subr.bf16.mxu0 %v2790_v49 }
 0x4fe   : > { %v2483_v53 = vpop.f32.mrb[4].mxu0 }
 0x4ff   : > { %945 = vst.msk [vmem:[#allocation4 + $0x10] sm:$0xff] %vm942_vm7, %v2483_v53  ;;  %v925_v13 = vpop.f32.mrb[5].mxu0  ;;  %v2734_v53 = vld [vmem:[%s566_s3 + $0x8] sm:$0xff]  }
 0x500   : > { %943 = vst.msk [vmem:[#allocation4] sm:$0xff] %vm942_vm7, %v925_v13  ;;  %v2484_v54 = vpop.f32.mrb[6].mxu0  ;;  %2524 = vmatpush3.bf16.msra.mxu0 %v2734_v53 }
 0x501   : > { %v928_v16 = vpop.f32.mrb[7].mxu0  ;;  %2525 = vmatprep.subr.bf16.mxu0 %v2790_v49 }
 0x502   : > { %944 = vst.msk [vmem:[#allocation4 + $0x8] sm:$0xff] %vm942_vm7, %v928_v16 }
 0x506   : > { %v3173_v4 = vld [vmem:[#allocation4 + $0x10] sm:$0xff] }
 0x507   : > { %v3163_v17 = vld [vmem:[#allocation4] sm:$0xff]  ;;  %v1248_v8 = vmul.f32 %v3173_v4, %v3173_v4  ;;  %v1226_v38 = vsel %vm942_vm7, %v3173_v4, 0.0 }
 0x508   : > { %v1246_v2 = vmul.f32 %v3163_v17, %v3163_v17  ;;  %v1223_v5 = vsel %vm942_vm7, %v3163_v17, 0.0 }
 0x509   : > { %v3161_v14 = vld [vmem:[#allocation4 + $0x8] sm:$0xff]  ;;  %v1255_v11 = vsel %vm942_vm7, %v1248_v8, 0.0 }
 0x50a   : > { %v1247_v57 = vmul.f32 %v3161_v14, %v3161_v14  ;;  %v1224_v0 = vsel %vm942_vm7, %v3161_v14, 0.0  ;;  %v1252_v10 = vsel %vm942_vm7, %v1246_v2, 0.0 }
 0x50b   : > { %v1225_v7 = vadd.f32 %v1224_v0, %v1223_v5 }
 0x50c   : > { %v1253_v6 = vsel %vm942_vm7, %v1247_v57, 0.0 }
 0x50d   : > { %v1254_v31 = vadd.f32 %v1253_v6, %v1252_v10  ;;  %v1227_v52 = vadd.f32 %v1226_v38, %v1225_v7  ;;  %v2736_v6 = vld [vmem:[%s566_s3 + $0x18] sm:$0xff]  }
 0x50e   : > { %v2519_v55 = vpop.f32.mrb[12].mxu1 }
 0x50f   : > { %1216 = vst.msk [vmem:[#allocation4 + $0x28] sm:$0xff] %vm942_vm7, %v2519_v55  ;;  %v1197_v62 = vpop.f32.mrb[13].mxu1  ;;  %v1256_v19 = vadd.f32 %v1255_v11, %v1254_v31 }
 0x510   : > { %1214 = vst.msk [vmem:[#allocation4 + $0x18] sm:$0xff] %vm942_vm7, %v1197_v62  ;;  %v2520_v63 = vpop.f32.mrb[14].mxu1 }
 0x511   : > { %v1200_v3 = vpop.f32.mrb[15].mxu1  ;;  %v2735_v63 = vld [vmem:[%s566_s3 + $0x10] sm:$0xff]  }
 0x512   : > { %1215 = vst.msk [vmem:[#allocation4 + $0x20] sm:$0xff] %vm942_vm7, %v1200_v3  ;;  %2526 = vmatpush3.bf16.msra.mxu0 %v2735_v63 }
 0x513   : > { %2527 = vmatprep.subr.bf16.mxu0 %v2790_v49 }
 0x516   : > { %v3193_v15 = vld [vmem:[#allocation4 + $0x28] sm:$0xff]  ;;  %2528 = vmatpush3.bf16.msra.mxu0 %v2736_v6 }
 0x517   : > { %v3184_v47 = vld [vmem:[#allocation4 + $0x18] sm:$0xff]  ;;  %v1232_v27 = vsel %vm942_vm7, %v3193_v15, 0.0  ;;  %v1251_v39 = vmul.f32 %v3193_v15, %v3193_v15  ;;  %2557 = vmatprep.subr.bf16.mxu0 %v2790_v49 }
 0x518   : > { %v1228_v61 = vsel %vm942_vm7, %v3184_v47, 0.0  ;;  %v1249_v1 = vmul.f32 %v3184_v47, %v3184_v47 }
 0x519   : > { %v3191_v12 = vld [vmem:[#allocation4 + $0x20] sm:$0xff]  ;;  %v1229_v18 = vadd.f32 %v1228_v61, %v1227_v52  ;;  %v1261_v44 = vsel %vm942_vm7, %v1251_v39, 0.0 }
 0x51a   : > { %v1230_v20 = vsel %vm942_vm7, %v3191_v12, 0.0  ;;  %v1250_v23 = vmul.f32 %v3191_v12, %v3191_v12  ;;  %v1257_v24 = vsel %vm942_vm7, %v1249_v1, 0.0 }
 0x51b   : > { %v1231_v25 = vadd.f32 %v1230_v20, %v1229_v18  ;;  %v1258_v26 = vadd.f32 %v1257_v24, %v1256_v19 }
 0x51c   : > { %v1259_v40 = vsel %vm942_vm7, %v1250_v23, 0.0 }
 0x51d   : > { %v1233_v41 = vadd.f32 %v1232_v27, %v1231_v25  ;;  %v1260_v42 = vadd.f32 %v1259_v40, %v1258_v26 }
 0x51f   : > { %1234 = vadd.xlane.f32.xlu0 %v1233_v41  ;;  %v1262_v48 = vadd.f32 %v1261_v44, %v1260_v42 }
 0x523   : > { %1263 = vadd.xlane.f32.xlu0 %v1262_v48 }
 0x5ac   : > { %v1235_v13 = vpop.xlane.xlu0 %1234 }
 0x5ad   : > { %v1236_v54 = vrot.slane %v1235_v13, 4 }
 0x5af   : > { %v1237_v16 = vadd.f32 %v1236_v54, %v1235_v13 }
 0x5b0   : > { %v1264_v55 = vpop.xlane.xlu0 %1263 }
 0x5b1   : > { %v1238_v57 = vrot.slane %v1237_v16, 2  ;;  %v1265_v62 = vrot.slane %v1264_v55, 4 }
 0x5b3   : > { %v1266_v0 = vadd.f32 %v1265_v62, %v1264_v55  ;;  %v1239_v2 = vadd.f32 %v1238_v57, %v1237_v16 }
 0x5b5   : > { %v1267_v3 = vrot.slane %v1266_v0, 2  ;;  %v1240_v5 = vrot.slane %v1239_v2, 1 }
 0x5b7   : > { %v1268_v7 = vadd.f32 %v1267_v3, %v1266_v0  ;;  %v1241_v8 = vadd.f32 %v1240_v5, %v1239_v2 }
 0x5b9   : > { %2686 = vpush %v1241_v8  ;;  %v1269_v10 = vrot.slane %v1268_v7, 1 }
 0x5bb   : > { %v1270_v31 = vadd.f32 %v1269_v10, %v1268_v7 }
 0x5bd   : > { %2688 = vpush %v1270_v31 }
 0x5ea   : > { %s2687_s26 = spop %2686 }
 0x5eb   : > { %s1245_s27 = smul.f32 0.00032552084, %s2687_s26 }
 0x5ed   : > { %s1275_s28 = smul.f32 %s1245_s27, %s1245_s27  ;;  %v1277_v61 = vstv %s1245_s27 }
 0x5ee   : > { %s2689_s29 = spop %2688  ;;  %v1278_v1 = vsub.f32 %v3163_v17, %v1277_v61  ;;  %v1279_v11 = vsub.f32 %v3161_v14, %v1277_v61  ;;  %v1280_v23 = vsub.f32 %v3173_v4, %v1277_v61  ;;  %v1281_v24 = vsub.f32 %v3184_v47, %v1277_v61 }
 0x5ef   : > { %s1274_s2 = smul.f32 0.00032552084, %s2689_s29  ;;  %v1282_v41 = vsub.f32 %v3191_v12, %v1277_v61  ;;  %v1283_v42 = vsub.f32 %v3193_v15, %v1277_v61 }
 0x5f1   : > { %s1276_s4 = ssub.f32 %s1274_s2, %s1275_s28 }
 0x5f3   : > { %s1284_s30 = sadd.f32 1e-05, %s1276_s4 }
 0x5f5   : > { %v1285_v38 = vstv %s1284_s30 }
 0x5f6   : > { %2747 = vrsqrt.f32 %v1285_v38 }
 0x600   : > { %v2748_v52 = vpop.eup %2747 }
 0x601   : > { %2690 = vpush %v2748_v52 }
 0x632   : > { %s2691_s0 = spop %2690 }
 0x633   : > { %v1288_v18 = vstv %s2691_s0 }
 0x634   : > { %v1289_v19 = vmul.f32 %v1288_v18, %v1278_v1  ;;  %v1290_v20 = vmul.f32 %v1288_v18, %v1279_v11  ;;  %v1291_v27 = vmul.f32 %v1288_v18, %v1280_v23  ;;  %v1292_v39 = vmul.f32 %v1288_v18, %v1281_v24  ;;  %v2738_v24 = vld [vmem:[%s3280_s18 + $0x18] sm:$0xff]  }
 0x635   : > { %v1293_v44 = vmul.f32 %v1288_v18, %v1282_v41  ;;  %v1294_v4 = vmul.f32 %v1288_v18, %v1283_v42 }
 0x636   : > { %v1295_v25 = vmax.f32 %v1289_v19, 0.0  ;;  %v1296_v26 = vmax.f32 %v1290_v20, 0.0  ;;  %v1297_v17 = vmax.f32 %v1291_v27, 0.0  ;;  %v1298_v14 = vmax.f32 %v1292_v39, 0.0 }
 0x637   : > { %v1299_v47 = vmax.f32 %v1293_v44, 0.0  ;;  %v1300_v51 = vmax.f32 %v1294_v4, 0.0  ;;  %v2276_v19 = vcombine.low %v3056_v36, %v3061_v37 }
 0x638   : > { %v1301_v40 = vpack.c.bf16 %v1296_v26, %v1295_v25  ;;  %v1302_v48 = vpack.c.bf16 %v1298_v14, %v1297_v17 }
 0x639   : > { %v1303_v53 = vpack.c.bf16 %v1300_v51, %v1299_v47  ;;  %v2739_v47 = vld [vmem:[%s3280_s18] sm:$0xff]  }
 0x63a   : > { %2530 = vmatmul.mubr.msk.bf16.vlgmr.msra.gmra.mrb[8].mxu0 %vm942_vm7, %v1301_v40 }
 0x63b   : > { %2533 = vmatprep.mubr.msk.bf16.mxu0 %vm2791_vm8, %v2790_v49 }
 0x642   : > { %2534 = vmatmul.mubr.msk.bf16.gmra.mrb[12].mxu0 %vm942_vm7, %v1302_v48 }
 0x643   : > { %2537 = vmatprep.mubr.msk.bf16.mxu0 %vm2791_vm8, %v2790_v49 }
 0x64a   : > { %2538 = vmatmul.mubr.msk.bf16.gmra.mrb[16].mxu0 %vm942_vm7, %v1303_v53 }
 0x64b   : > { %2561 = vmatprep.mubr.msk.bf16.mxu0 %vm2791_vm8, %v2790_v49 }
 0x70d   : > { %v1371_v13 = vpop.f32.mrb[8].mxu0 }
 0x70e   : > { %v2069_v12 = vmul.f32 0.1, %v1371_v13  ;;  %v2531_v54 = vpop.f32.mrb[9].mxu0 }
 0x70f   : > { %v1374_v15 = vpop.f32.mrb[10].mxu0 }
 0x710   : > { %v2075_v16 = vadd.f32 %v2069_v12, %v3128_v21  ;;  %v1394_v55 = vpack.c.bf16 %v1374_v15, %v1371_v13  ;;  %v2070_v57 = vmul.f32 0.1, %v1374_v15  ;;  %v2532_v62 = vpop.f32.mrb[11].mxu0  ;;  %v2740_v15 = vld [vmem:[%s3280_s18 + $0x8] sm:$0xff]  }
 0x712   : > { %2081 = vst.msk [vmem:[#allocation3] sm:$0xff] %vm133_vm5, %v2075_v16  ;;  %v2076_v63 = vadd.f32 %v2070_v57, %v3130_v22  ;;  %2542 = vmatpush3.bf16.msra.mxu1 %v1394_v55  ;;  %v2274_v22 = vcombine.low %v3046_v34, %v3051_v35 }
 0x713   : > { %2543 = vmatprep.subr.bf16.mxu1 %v2790_v49 }
 0x714   : > { %2082 = vst.msk [vmem:[#allocation3 + $0x8] sm:$0xff] %vm133_vm5, %v2076_v63  ;;  %v2741_v63 = vld [vmem:[%s3280_s18 + $0x20] sm:$0xff]  }
 0x715   : > { %v1379_v0 = vpop.f32.mrb[12].mxu0 }
 0x716   : > { %v1395_v2 = vpack.c.bf16 %v1379_v0, %v1379_v0  ;;  %v2071_v3 = vmul.f32 0.1, %v1379_v0  ;;  %v2535_v5 = vpop.f32.mrb[13].mxu0 }
 0x717   : > { %v1382_v6 = vpop.f32.mrb[14].mxu0 }
 0x718   : > { %v2077_v21 = vadd.f32 %v2071_v3, %v3140_v43  ;;  %v2072_v7 = vmul.f32 0.1, %v1382_v6  ;;  %v2536_v8 = vpop.f32.mrb[15].mxu0  ;;  %v1407_v10 = vsel %vm1405_vm9, %v1395_v2, 0 }
 0x719   : > { %2544 = vmatpush3.bf16.msra.mxu1 %v1407_v10  ;;  %v2742_v8 = vld [vmem:[%s3280_s18 + $0x28] sm:$0xff]   ;;  %v2168_v28 = vld [vmem:[#allocation3] sm:$0xff] (%p545_p0) }
 0x71a   : > { %2083 = vst.msk [vmem:[#allocation3 + $0x10] sm:$0xff] %vm133_vm5, %v2077_v21  ;;  %v2078_v31 = vadd.f32 %v2072_v7, %v3144_v45  ;;  %2549 = vmatprep.subr.bf16.mxu1 %v2790_v49  ;;  %2174 = vst.msk [vmem:[%s3426_s16] sm:$0xff] (%p545_p0), %vm133_vm5, %v2168_v28 }
 0x71b   :  { %v2169_v29 = vld [vmem:[#allocation3 + $0x8] sm:$0xff] (%p545_p0) }
 0x71c   : > { %2084 = vst.msk [vmem:[#allocation3 + $0x18] sm:$0xff] %vm133_vm5, %v2078_v31  ;;  %2546 = vmatmul.mubr.msk.bf16.vlgmr.msra.gmra.mrb[16].mxu1 %vm1401_vm10, %v2274_v22  ;;  %2175 = vst.msk [vmem:[%s3426_s16 + $0x8] sm:$0xff] (%p545_p0), %vm133_vm5, %v2169_v29 }
 0x71d   : > { %v1387_v43 = vpop.f32.mrb[16].mxu0  ;;  %2550 = vmatpush3.bf16.msra.mxu1 %v1394_v55  ;;  %2553 = vmatprep.mubr.msk.bf16.mxu1 %vm2791_vm8, %v2790_v49 }
 0x71e   : > { %v1679_v38 = vpack.c.bf16 %v1387_v43, %v1382_v6  ;;  %v2073_v52 = vmul.f32 0.1, %v1387_v43  ;;  %v2539_v61 = vpop.f32.mrb[17].mxu0  ;;  %2551 = vmatprep.subr.bf16.mxu1 %v2790_v49 }
 0x71f   : > { %v1390_v1 = vpop.f32.mrb[18].mxu0 }
 0x720   : > { %v2079_v11 = vadd.f32 %v2073_v52, %v3146_v46  ;;  %v2074_v45 = vmul.f32 0.1, %v1390_v1  ;;  %v2540_v18 = vpop.f32.mrb[19].mxu0  ;;  %v1680_v23 = vpack.c.bf16 %v1390_v1, %v1390_v1 }
 0x721   : > { %2552 = vmatpush3.bf16.msra.mxu1 %v1407_v10  ;;  %v2170_v30 = vld [vmem:[#allocation3 + $0x10] sm:$0xff] (%p545_p0) }
 0x722   : > { %2085 = vst.msk [vmem:[#allocation3 + $0x20] sm:$0xff] %vm133_vm5, %v2079_v11  ;;  %v2080_v20 = vadd.f32 %v2074_v45, %v3153_v50  ;;  %2581 = vmatprep.subr.bf16.mxu1 %v2790_v49  ;;  %v1682_v46 = vsel %vm1405_vm9, %v1680_v23, 0  ;;  %v2737_v50 = vld [vmem:[%s3280_s18 + $0x10] sm:$0xff]   ;;  %2176 = vst.msk [vmem:[%s3426_s16 + $0x10] sm:$0xff] (%p545_p0), %vm133_vm5, %v2170_v30  ;;  %s2185_s18 = sshll.u32 (%p545_p0), %s2792_s11, 4  ;;  %s2186_s18 = int_to_ptr.vmem [resolvable:$true] %s2185_s18 }
 0x723   : > { %2558 = vmatpush3.bf16.msra.mxu0 %v2737_v50  ;;  %v2171_v9 = vld [vmem:[#allocation3 + $0x18] sm:$0xff] (%p545_p0)  ;;  %s2755_s1 = scalar_lea.vmem (%p545_p0), %s2186_s18, 512  ;;  %p2760_p2 = scmp.lt.s32.totalorder (%p545_p0), %s2186_s18, %s2186_s18 }
 0x724   : > { %2086 = vst.msk [vmem:[#allocation3 + $0x28] sm:$0xff] %vm133_vm5, %v2080_v20  ;;  %2554 = vmatmul.mubr.msk.bf16.vlgmr.msra.gmra.mrb[20].mxu1 %vm1401_vm10, %v2276_v19  ;;  %2559 = vmatprep.subr.bf16.mxu0 %v2790_v49  ;;  %2177 = vst.msk [vmem:[%s3426_s16 + $0x18] sm:$0xff] (%p545_p0), %vm133_vm5, %v2171_v9  ;;  %p2756_p1 = scmp.ne.s32.totalorder (%p545_p0), %s2186_s18, %s2755_s1  ;;  %p2761_p3 = scmp.lt.s32.totalorder (%p545_p0), %s2755_s1, %s2755_s1 }
 0x725   : > { %2582 = vmatpush3.bf16.msra.mxu1 %v1679_v38  ;;  %2585 = vmatprep.mubr.msk.bf16.mxu1 %vm2791_vm8, %v2790_v49 }
 0x726   : > { %2583 = vmatprep.subr.bf16.mxu1 %v2790_v49  ;;  %p2762_p4 = por (%p545_p0), %p2761_p3, %p2760_p2 }
 0x727   : > { %2560 = vmatpush3.bf16.msra.mxu0 %v2738_v24 }
 0x728   : > { %2565 = vmatprep.subr.bf16.mxu0 %v2790_v49  ;;  %p2763_p5 = pnand (%p545_p0), %p2762_p4, %p2756_p1 }
 0x729   : > { %2584 = vmatpush3.bf16.msra.mxu1 %v1682_v46  ;;  %v2172_v32 = vld [vmem:[#allocation3 + $0x20] sm:$0xff] (%p545_p0) }
 0x72a   : > { %2589 = vmatprep.subr.bf16.mxu1 %v2790_v49  ;;  %2178 = vst.msk [vmem:[%s3426_s16 + $0x20] sm:$0xff] (%p545_p0), %vm133_vm5, %v2172_v32 }
 0x72b   :  { %v2173_v33 = vld [vmem:[#allocation3 + $0x28] sm:$0xff] (%p545_p0) }
 0x72c   : > { %2586 = vmatmul.mubr.msk.bf16.vlgmr.msra.gmra.mrb[24].mxu1 %vm1401_vm10, %v2274_v22  ;;  %2179 = vst.msk [vmem:[%s3426_s16 + $0x28] sm:$0xff] (%p545_p0), %vm133_vm5, %v2173_v33 }
 0x72d   : > { %2590 = vmatpush3.bf16.msra.mxu1 %v1679_v38  ;;  %2593 = vmatprep.mubr.msk.bf16.mxu1 %vm2791_vm8, %v2790_v49 }
 0x72e   : > { %2591 = vmatprep.subr.bf16.mxu1 %v2790_v49 }
 0x731   : > { %2592 = vmatpush3.bf16.msra.mxu1 %v1682_v46 }
 0x732   : > { %2597 = vmatprep.subr.bf16.mxu1 %v2790_v49 }
 0x734   : > { %2594 = vmatmul.mubr.msk.bf16.vlgmr.msra.gmra.mrb[28].mxu1 %vm1401_vm10, %v2276_v19 }
 0x735   : > { %2601 = vmatprep.mubr.msk.bf16.mxu1 %vm2791_vm8, %v2790_v49  ;;  %2598 = vmatpush3.bf16.msra.mxu1 %v2737_v50 }
 0x736   : > { %2599 = vmatprep.subr.bf16.mxu1 %v2790_v49 }
 0x739   : > { %2600 = vmatpush3.bf16.msra.mxu1 %v2738_v24 }
 0x73a   : > { %2605 = vmatprep.subr.bf16.mxu1 %v2790_v49 }
 0x7ef   : > { %v1443_v25 = vpop.f32.mrb[16].mxu1 }
 0x7f0   : > { %v2547_v26 = vpop.f32.mrb[17].mxu1 }
 0x7f1   : > { %v1446_v27 = vpop.f32.mrb[18].mxu1 }
 0x7f2   : > { %v2548_v39 = vpop.f32.mrb[19].mxu1 }
 0x7f7   : > { %v1492_v40 = vpop.f32.mrb[20].mxu1 }
 0x7f8   : > { %v1499_v17 = vadd.f32 %v1492_v40, %v1443_v25  ;;  %v1503_v14 = vsub.f32 %v1443_v25, %v1492_v40  ;;  %v2555_v41 = vpop.f32.mrb[21].mxu1 }
 0x7f9   : > { %v1495_v42 = vpop.f32.mrb[22].mxu1 }
 0x7fa   : > { %v1500_v44 = vadd.f32 %v1495_v42, %v1446_v27  ;;  %v1504_v4 = vsub.f32 %v1446_v27, %v1495_v42  ;;  %v2556_v48 = vpop.f32.mrb[23].mxu1  ;;  %v1501_v51 = vmul.f32 0.5, %v1499_v17 }
 0x7fc   : > { %v1502_v53 = vmul.f32 0.5, %v1500_v44  ;;  %v1506_v13 = vpack.c.bf16 %v1504_v4, %v1503_v14 }
 0x7fe   : > { %v1505_v12 = vpack.c.bf16 %v1502_v53, %v1501_v51  ;;  %2562 = vmatmul.mubr.msk.bf16.vlgmr.msra.gmra.mrb[20].mxu0 %vm133_vm5, %v1506_v13  ;;  %v2743_v53 = vld [vmem:[%s590_s20] sm:$0xff]   ;;  %v2744_v13 = vld [vmem:[%s590_s20 + $0x8] sm:$0xff]  }
 0x7ff   : > { %v1718_v54 = vpop.f32.mrb[24].mxu1  ;;  %2566 = vmatpush3.bf16.msra.mxu0 %v2739_v47  ;;  %2569 = vmatprep.mubr.msk.bf16.mxu0 %vm2791_vm8, %v2790_v49 }
 0x800   : > { %v2587_v16 = vpop.f32.mrb[25].mxu1  ;;  %2567 = vmatprep.subr.bf16.mxu0 %v2790_v49 }
 0x801   : > { %v1721_v55 = vpop.f32.mrb[26].mxu1 }
 0x802   : > { %v2588_v57 = vpop.f32.mrb[27].mxu1 }
 0x803   : > { %2568 = vmatpush3.bf16.msra.mxu0 %v2740_v15 }
 0x804   : > { %2573 = vmatprep.subr.bf16.mxu0 %v2790_v49 }
 0x807   : > { %v1759_v62 = vpop.f32.mrb[28].mxu1 }
 0x808   : > { %v1766_v0 = vadd.f32 %v1759_v62, %v1718_v54  ;;  %v1770_v2 = vsub.f32 %v1718_v54, %v1759_v62  ;;  %v2595_v3 = vpop.f32.mrb[29].mxu1  ;;  %v2745_v62 = vld [vmem:[%s590_s20 + $0x10] sm:$0xff]  }
 0x809   : > { %v1762_v5 = vpop.f32.mrb[30].mxu1 }
 0x80a   : > { %v1767_v6 = vadd.f32 %v1762_v5, %v1721_v55  ;;  %v1771_v21 = vsub.f32 %v1721_v55, %v1762_v5  ;;  %2570 = vmatmul.mubr.msk.bf16.vlgmr.msra.gmra.mrb[20].mxu0 %vm133_vm5, %v1505_v12  ;;  %v2596_v7 = vpop.f32.mrb[31].mxu1  ;;  %v1768_v10 = vmul.f32 0.5, %v1766_v0  ;;  %v2746_v5 = vld [vmem:[%s590_s20 + $0x18] sm:$0xff]  }
 0x80b   : > { %2574 = vmatpush3.bf16.msra.mxu0 %v2741_v63  ;;  %2577 = vmatprep.mubr.msk.bf16.mxu0 %vm2791_vm8, %v2790_v49 }
 0x80c   : > { %v1769_v22 = vmul.f32 0.5, %v1767_v6  ;;  %v1773_v31 = vpack.c.bf16 %v1771_v21, %v1770_v2  ;;  %2575 = vmatprep.subr.bf16.mxu0 %v2790_v49 }
 0x80e   : > { %v1772_v43 = vpack.c.bf16 %v1769_v22, %v1768_v10  ;;  %2602 = vmatmul.mubr.msk.bf16.vlgmr.msra.gmra.mrb[32].mxu1 %vm133_vm5, %v1773_v31 }
 0x80f   : > { %2606 = vmatpush3.bf16.msra.mxu1 %v2739_v47  ;;  %2576 = vmatpush3.bf16.msra.mxu0 %v2742_v8 }
 0x810   : > { %2607 = vmatprep.subr.bf16.mxu1 %v2790_v49  ;;  %2609 = vmatprep.mubr.msk.bf16.mxu1 %vm2791_vm8, %v2790_v49 }
 0x811   : > { %2621 = vmatprep.subr.bf16.mxu0 %v2743_v53 }
 0x813   : > { %2608 = vmatpush3.bf16.msra.mxu1 %v2740_v15 }
 0x814   : > { %2613 = vmatprep.subr.bf16.mxu1 %v2790_v49 }
 0x816   : > { %2578 = vmatmul.mubr.msk.bf16.vlgmr.msra.gmra.mrb[20].mxu0 %vm133_vm5, %v3084_v58 }
 0x817   : > { %2622 = vmatpush3.bf16.msra.mxu0 %v2743_v53 }
 0x818   : > { %2623 = vmatprep.subr.bf16.mxu0 %v2744_v13 }
 0x81a   : > { %2610 = vmatmul.mubr.msk.bf16.vlgmr.msra.gmra.mrb[32].mxu1 %vm133_vm5, %v1772_v43 }
 0x81b   : > { %2614 = vmatpush3.bf16.msra.mxu1 %v2741_v63  ;;  %2617 = vmatprep.mubr.msk.bf16.mxu1 %vm2791_vm8, %v2790_v49 }
 0x81c   : > { %2615 = vmatprep.subr.bf16.mxu1 %v2790_v49  ;;  %2624 = vmatpush3.bf16.msra.mxu0 %v2744_v13 }
 0x81d   : > { %2625 = vmatprep.subr.bf16.mxu0 %v2745_v62 }
 0x81f   : > { %2616 = vmatpush3.bf16.msra.mxu1 %v2742_v8 }
 0x820   : > { %2626 = vmatpush3.bf16.msra.mxu0 %v2745_v62 }
 0x821   : > { %2627 = vmatprep.subr.bf16.mxu0 %v2746_v5 }
 0x824   : > { %2628 = vmatpush3.bf16.msra.mxu0 %v2746_v5 }
 0x826   : > { %2618 = vmatmul.mubr.msk.bf16.vlgmr.msra.gmra.mrb[32].mxu1 %vm133_vm5, %v3091_v60 }
 0x8e9   : > { %v1668_v38 = vpop.f32.mrb[20].mxu0 }
 0x8ea   : > { %1677 = vst.msk [vmem:[#allocation5] sm:$0xff] %vm942_vm7, %v1668_v38  ;;  %v2579_v52 = vpop.f32.mrb[21].mxu0 }
 0x8eb   : > { %v1671_v61 = vpop.f32.mrb[22].mxu0 }
 0x8ec   : > { %1678 = vst.msk [vmem:[#allocation5 + $0x8] sm:$0xff] %vm942_vm7, %v1671_v61  ;;  %v2580_v58 = vpop.f32.mrb[23].mxu0 }
 0x8f1   : > { %v3319_v49 = vld [vmem:[#allocation5] sm:$0xff] }
 0x8f2   : > { %v1933_v23 = vmul.f32 %v3319_v49, %v3319_v49  ;;  %v1914_v46 = vsel %vm942_vm7, %v3319_v49, 0.0 }
 0x8f3   : > { %v3316_v11 = vld [vmem:[#allocation5 + $0x8] sm:$0xff] }
 0x8f4   : > { %v1934_v19 = vmul.f32 %v3316_v11, %v3316_v11  ;;  %v1915_v20 = vsel %vm942_vm7, %v3316_v11, 0.0  ;;  %v1937_v39 = vsel %vm942_vm7, %v1933_v23, 0.0 }
 0x8f5   : > { %v1916_v25 = vadd.f32 %v1915_v20, %v1914_v46 }
 0x8f6   : > { %v1938_v50 = vsel %vm942_vm7, %v1934_v19, 0.0 }
 0x8f7   : > { %v1939_v14 = vadd.f32 %v1938_v50, %v1937_v39 }
 0x8f9   : > { %v1899_v1 = vpop.f32.mrb[32].mxu1 }
 0x8fa   : > { %1908 = vst.msk [vmem:[#allocation5 + $0x10] sm:$0xff] %vm942_vm7, %v1899_v1  ;;  %v2619_v45 = vpop.f32.mrb[33].mxu1 }
 0x8fb   : > { %v1902_v18 = vpop.f32.mrb[34].mxu1 }
 0x8fc   : > { %1909 = vst.msk [vmem:[#allocation5 + $0x18] sm:$0xff] %vm942_vm7, %v1902_v18  ;;  %v2620_v60 = vpop.f32.mrb[35].mxu1 }
 0x901   : > { %v3331_v24 = vld [vmem:[#allocation5 + $0x10] sm:$0xff] }
 0x902   : > { %v1917_v26 = vsel %vm942_vm7, %v3331_v24, 0.0  ;;  %v1935_v27 = vmul.f32 %v3331_v24, %v3331_v24 }
 0x903   : > { %v3338_v40 = vld [vmem:[#allocation5 + $0x18] sm:$0xff]  ;;  %v1918_v17 = vadd.f32 %v1917_v26, %v1916_v25 }
 0x904   : > { %v1919_v41 = vsel %vm942_vm7, %v3338_v40, 0.0  ;;  %v1936_v42 = vmul.f32 %v3338_v40, %v3338_v40  ;;  %v1940_v44 = vsel %vm942_vm7, %v1935_v27, 0.0 }
 0x905   : > { %v1920_v4 = vadd.f32 %v1919_v41, %v1918_v17  ;;  %v1941_v48 = vadd.f32 %v1940_v44, %v1939_v14  ;;  %v2751_v14 = vld [vmem:[#allocation2] sm:$0xff] }
 0x906   : > { %v1942_v47 = vsel %vm942_vm7, %v1936_v42, 0.0 }
 0x907   : > { %1921 = vadd.xlane.f32.xlu1 %v1920_v4  ;;  %v1943_v51 = vadd.f32 %v1942_v47, %v1941_v48  ;;  %v2752_v4 = vld [vmem:[#allocation2 + $0x8] sm:$0xff] }
 0x90b   : > { %1944 = vadd.xlane.f32.xlu1 %v1943_v51 }
 0x994   : > { %v1922_v12 = vpop.xlane.xlu1 %1921 }
 0x995   : > { %v1923_v54 = vrot.slane %v1922_v12, 4 }
 0x997   : > { %v1924_v15 = vadd.f32 %v1923_v54, %v1922_v12 }
 0x998   : > { %v1945_v16 = vpop.xlane.xlu1 %1944 }
 0x999   : > { %v1925_v55 = vrot.slane %v1924_v15, 2  ;;  %v1946_v57 = vrot.slane %v1945_v16, 4 }
 0x99b   : > { %v1947_v63 = vadd.f32 %v1946_v57, %v1945_v16  ;;  %v1926_v0 = vadd.f32 %v1925_v55, %v1924_v15 }
 0x99d   : > { %v1948_v2 = vrot.slane %v1947_v63, 2  ;;  %v1927_v3 = vrot.slane %v1926_v0, 1 }
 0x99f   : > { %v1949_v6 = vadd.f32 %v1948_v2, %v1947_v63  ;;  %v1928_v21 = vadd.f32 %v1927_v3, %v1926_v0 }
 0x9a1   : > { %2692 = vpush %v1928_v21  ;;  %v1950_v7 = vrot.slane %v1949_v6, 1 }
 0x9a3   : > { %v1951_v8 = vadd.f32 %v1950_v7, %v1949_v6 }
 0x9a5   : > { %2694 = vpush %v1951_v8 }
 0x9d2   : > { %s2693_s21 = spop %2692 }
 0x9d3   : > { %s1932_s13 = smul.f32 0.00048828125, %s2693_s21 }
 0x9d5   : > { %s1956_s14 = smul.f32 %s1932_s13, %s1932_s13  ;;  %v1958_v31 = vstv %s1932_s13 }
 0x9d6   : > { %s2695_s22 = spop %2694  ;;  %v1959_v43 = vsub.f32 %v3319_v49, %v1958_v31  ;;  %v1960_v38 = vsub.f32 %v3316_v11, %v1958_v31  ;;  %v1961_v52 = vsub.f32 %v3331_v24, %v1958_v31  ;;  %v1962_v61 = vsub.f32 %v3338_v40, %v1958_v31 }
 0x9d7   : > { %s1955_s5 = smul.f32 0.00048828125, %s2695_s22 }
 0x9d9   : > { %s1957_s23 = ssub.f32 %s1955_s5, %s1956_s14 }
 0x9db   : > { %s1963_s24 = sadd.f32 1e-05, %s1957_s23 }
 0x9dd   : > { %v1964_v10 = vstv %s1963_s24 }
 0x9de   : > { %2749 = vrsqrt.f32 %v1964_v10 }
 0x9e8   : > { %v2750_v22 = vpop.eup %2749 }
 0x9e9   : > { %2696 = vpush %v2750_v22 }
 0xa1a   : > { %s2697_s25 = spop %2696 }
 0xa1b   : > { %v1967_v58 = vstv %s2697_s25 }
 0xa1c   : > { %v1968_v1 = vmul.f32 %v1967_v58, %v1959_v43  ;;  %v1969_v45 = vmul.f32 %v1967_v58, %v1960_v38  ;;  %v1970_v18 = vmul.f32 %v1967_v58, %v1961_v52  ;;  %v1971_v60 = vmul.f32 %v1967_v58, %v1962_v61 }
 0xa1e   : > { %v1972_v19 = vmax.f32 %v1968_v1, 0.0  ;;  %v1973_v20 = vmax.f32 %v1969_v45, 0.0  ;;  %v1974_v23 = vmax.f32 %v1970_v18, 0.0  ;;  %v1975_v46 = vmax.f32 %v1971_v60, 0.0 }
 0xa20   : > { %v1976_v50 = vpack.c.bf16 %v1973_v20, %v1972_v19  ;;  %v1977_v25 = vpack.c.bf16 %v1975_v46, %v1974_v23 }
 0xa22   : > { %2629 = vmatprep.mubr.msk.bf16.mxu0 %vm942_vm7, %v1976_v50 }
 0xa23   : > { %2630 = vmatmul.mubr.msk.bf16.vlgmr.msra.gmra.mrb[24].mxu0 %vm942_vm7, %v1977_v25 }
 0xaf6   : > { %v2631_v11 = vpop.f32.mrb[24].mxu0 }
 0xaf7   : > { %v2059_v49 = vmul.f32 0.1, %v2631_v11  ;;  %v2042_v24 = vpop.f32.mrb[25].mxu0 }
 0xaf8   : > { %v2057_v26 = vmul.f32 0.1, %v2042_v24  ;;  %v2632_v27 = vpop.f32.mrb[26].mxu0  ;;  %547 = sbr.rel (!%p545_p0) target bundleno = 818 (0x332), region = 99 }
 0xaf9   : > { %v2063_v39 = vadd.f32 %v2059_v49, %v3080_v56  ;;  %v2060_v40 = vmul.f32 0.1, %v2632_v27  ;;  %v2045_v17 = vpop.f32.mrb[27].mxu0  ;;  %v2753_v56 = vld [vmem:[%s3420_s10] sm:$0xff] (%p545_p0)  }
 0xafa   : > { %v2061_v41 = vadd.f32 %v2751_v14, %v2057_v26  ;;  %v2058_v42 = vmul.f32 0.1, %v2045_v17  ;;  %2633 = vmatprep.subr.bf16.mxu0 (%p545_p0), %v2753_v56 }
 0xafb   : > { %2067 = vst.msk [vmem:[#allocation2 + $0x10] sm:$0xff] %vm133_vm5, %v2063_v39  ;;  %v2064_v44 = vadd.f32 %v2060_v40, %v3086_v59  ;;  %v2754_v59 = vld [vmem:[%s3420_s10 + $0x8] sm:$0xff] (%p545_p0)   ;;  %2634 = vmatpush3.bf16.msra.mxu0 (%p545_p0), %v2753_v56 }
 0xafc   : > { %2065 = vst.msk [vmem:[#allocation2] sm:$0xff] %vm133_vm5, %v2061_v41  ;;  %v2062_v48 = vadd.f32 %v2752_v4, %v2058_v42  ;;  %2635 = vmatprep.subr.bf16.mxu0 (%p545_p0), %v2754_v59 }
 0xafd   : > { %2068 = vst.msk [vmem:[#allocation2 + $0x18] sm:$0xff] %vm133_vm5, %v2064_v44 }
 0xafe   : > { %2066 = vst.msk [vmem:[#allocation2 + $0x8] sm:$0xff] %vm133_vm5, %v2062_v48 }
 0xaff   :  { %2636 = vmatpush3.bf16.msra.mxu0 %v2754_v59 }
 0xb02   :  { %v2089_v13 = vld [vmem:[#allocation2 + $0x10] sm:$0xff] }
 0xb03   :  { %v2087_v47 = vld [vmem:[#allocation2] sm:$0xff] }
 0xb04   :  { %v2090_v12 = vld [vmem:[#allocation2 + $0x18] sm:$0xff] }
 0xb05   :  { %v2088_v51 = vld [vmem:[#allocation2 + $0x8] sm:$0xff]  ;;  %v2092_v54 = vpack.c.bf16 %v2090_v12, %v2089_v13 }
 0xb06   :  { %v2091_v53 = vpack.c.bf16 %v2088_v51, %v2087_v47 }
 0xb08   :  { %2637 = vmatprep.mubr.msk.bf16.mxu0 %vm133_vm5, %v2091_v53 }
 0xb09   :  { %2638 = vmatmul.mubr.msk.bf16.vlgmr.msra.gmra.mrb[0].mxu0 %vm133_vm5, %v2092_v54 }
 0xbdc   :  { %v2639_v34 = vpop.f32.mrb[0].mxu0 }
 0xbdd   :  { %2166 = vst [vmem:[#allocation6 + $0x10] sm:$0xff] %v2639_v34  ;;  %v2149_v35 = vpop.f32.mrb[1].mxu0 }
 0xbde   :  { %2164 = vst [vmem:[#allocation6] sm:$0xff] %v2149_v35  ;;  %v2640_v36 = vpop.f32.mrb[2].mxu0 }
 0xbdf   :  { %2167 = vst [vmem:[#allocation6 + $0x18] sm:$0xff] %v2640_v36  ;;  %v2152_v37 = vpop.f32.mrb[3].mxu0 }
 0xbe0   :  { %2165 = vst [vmem:[#allocation6 + $0x8] sm:$0xff] %v2152_v37 }
 0xbe1   :  { %2766 = shalt.err (!%p2763_p5)
}
 0xbe2   :  { %s2767_s20 = scalar_lea.hbm %s3425_s15, 512 }
 0xbe3   :  { %p2768_p6 = scmp.ne.s32.totalorder %s3425_s15, %s2767_s20  ;;  %p2771_p7 = scmp.lt.u32.totalorder %s2767_s20, %s3425_s15 }
 0xbe5   :  { %p2773_p8 = pnand %p2771_p7, %p2768_p6 }
 0xbe7   :  { %2776 = shalt.err (!%p2773_p8)
}
 0xbe8   :  { %s2793_s5 = smov 128   ;;  %s2794_s23 = smov 8  }
 0xbe9   :  { %2191 = dma.vmem_to_hbm [thread:$0]  %s2186_s18, 512, %s3425_s15, [#allocation7], %s2793_s5, %s2793_s5, %s2794_s23  }
 0xbea   :  { %2781 = dma.done.wait [#allocation7], 512  }
 0xbeb   :  { %2782 = vsyncadd [#allocation7], 4294966784 }
 0xbec   :  { %2199 = vsyncpa [#allocation7], 1 }

</bundles_post_ra>
